<compile_context>
chip_gen: v7x
topology: tpu7x:2x2x1
jax: 0.10.0
libtpu: 0.0.40
codegen_flags: <defaults>
</compile_context>

<pallas_src>
import math
from functools import partial

import jax
import jax.numpy as jnp
from jax.experimental import pallas as pl
from jax.experimental.pallas import tpu as pltpu  # noqa: F401  (TPU backend)


# -----------------------------------------------------------------------------
# Fused forward kernel (whole model, single invocation)
# -----------------------------------------------------------------------------
def _fused_tst_kernel(x_ref, pw_ref, pb_ref, pe_ref,
                      wqkv_ref, bqkv_ref, wo_ref, w1_ref, b1_ref, w2_ref,
                      lvec_ref, ow_ref, ob_ref, out_ref,
                      *, B, S, C, D, H, F, L, OUT_ROWS, eps):
    hd = D // H
    M = B * S

    def layer_norm(t, g, b):
        mu = jnp.mean(t, axis=-1, keepdims=True)
        var = jnp.mean((t - mu) ** 2, axis=-1, keepdims=True)
        return (t - mu) * jax.lax.rsqrt(var + eps) * g + b

    # --- input projection (sqrt(D) folded into pw/pb) + positional encoding ---
    x2 = x_ref[...].reshape(M, C)                                       # (M, C)
    h = jnp.dot(x2, pw_ref[...], preferred_element_type=jnp.float32) + pb_ref[...]
    h = (h.reshape(B, S, D) + pe_ref[...]).reshape(M, D)                # (M, D)

    for l in range(L):                                   # static unroll (L = 2)
        lv = lvec_ref[l]                         # (6, D): bo, g1, be1, b2, g2, be2

        # --- fused QKV projection (q block pre-scaled by 1/sqrt(hd)) ---------
        qkv = jnp.dot(h, wqkv_ref[l],
                      preferred_element_type=jnp.float32) + bqkv_ref[l]  # (M, 3D)
        qkv3 = qkv.reshape(B, S, 3 * D)

        # heads stacked on the leading dim: rows [hh*B:(hh+1)*B] = head hh
        qh = jnp.concatenate(
            [qkv3[:, :, hh * hd:(hh + 1) * hd] for hh in range(H)], axis=0)
        kh = jnp.concatenate(
            [qkv3[:, :, D + hh * hd:D + (hh + 1) * hd] for hh in range(H)], axis=0)
        vh = jnp.concatenate(
            [qkv3[:, :, 2 * D + hh * hd:2 * D + (hh + 1) * hd] for hh in range(H)],
            axis=0)                                                     # (H*B, S, hd)

        # --- scaled dot-product attention, exact softmax over keys -----------
        sc = jnp.einsum('bqd,bkd->bqk', qh, kh,
                        preferred_element_type=jnp.float32)             # (H*B, S, S)
        sc = sc - jnp.max(sc, axis=-1, keepdims=True)
        p = jnp.exp(sc)
        p = p / jnp.sum(p, axis=-1, keepdims=True)
        oh = jnp.einsum('bqk,bkd->bqd', p, vh,
                        preferred_element_type=jnp.float32)             # (H*B, S, hd)

        # --- concat heads along features, single (M,D)x(D,D) output proj -----
        o_cat = jnp.concatenate([oh[hh * B:(hh + 1) * B] for hh in range(H)],
                                axis=-1)                                # (B, S, D)
        attn = jnp.dot(o_cat.reshape(M, D), wo_ref[l],
                       preferred_element_type=jnp.float32) + lv[0:1]    # (M, D)

        # --- residual + LayerNorm 1 ------------------------------------------
        x1 = layer_norm(h + attn, lv[1:2], lv[2:3])                     # (M, D)

        # --- feed-forward (relu) ----------------------------------------------
        ff = jnp.dot(x1, w1_ref[l], preferred_element_type=jnp.float32) + b1_ref[l]
        ff = jnp.maximum(ff, 0.0)
        ff = jnp.dot(ff, w2_ref[l], preferred_element_type=jnp.float32) + lv[3:4]

        # --- residual + LayerNorm 2 ------------------------------------------
        h = layer_norm(x1 + ff, lv[4:5], lv[5:6])                       # (M, D)

    # --- final relu + flatten (s-major) + output Linear as one K=S*D matmul ---
    y3 = jnp.maximum(h, 0.0).reshape(B, S, D)
    y_flat = jnp.concatenate([y3[:, s, :] for s in range(S)], axis=-1)  # (B, S*D)
    if OUT_ROWS > B:   # pad rows to the 8-sublane tile -> unmasked final store
        y_flat = jnp.concatenate(
            [y_flat, jnp.zeros((OUT_ROWS - B, S * D), jnp.float32)], axis=0)
    out_ref[...] = jnp.dot(y_flat, ow_ref[...],
                           preferred_element_type=jnp.float32) + ob_ref[...]


# -----------------------------------------------------------------------------
# Wrapper
# -----------------------------------------------------------------------------
def tst_forward(x, packed, *, B, S, C, D, H, F, L, num_classes):
    out_rows = ((B + 7) // 8) * 8
    nc_pad = packed["ow"].shape[1]
    kernel = partial(_fused_tst_kernel, B=B, S=S, C=C, D=D, H=H, F=F, L=L,
                     OUT_ROWS=out_rows, eps=1e-5)
    out = pl.pallas_call(
        kernel,
        out_shape=jax.ShapeDtypeStruct((out_rows, nc_pad), jnp.float32),
    )(x, packed["pw"], packed["pb"], packed["pe"],
      packed["wqkv"], packed["bqkv"], packed["wo"],
      packed["w1"], packed["b1"], packed["w2"],
      packed["lvec"], packed["ow"], packed["ob"])
    return out[:B, :num_classes]


# -----------------------------------------------------------------------------
# Parameter construction / host-side packing (layout plumbing only, O(1) in B)
# -----------------------------------------------------------------------------
def fixed_positional_encoding(max_len, d_model):
    position = jnp.arange(max_len, dtype=jnp.float32)[:, None]
    div_term = jnp.exp(jnp.arange(0, d_model, 2, dtype=jnp.float32)
                       * (-math.log(10000.0) / d_model))
    pe = jnp.zeros((max_len, d_model), jnp.float32)
    pe = pe.at[:, 0::2].set(jnp.sin(position * div_term))
    pe = pe.at[:, 1::2].set(jnp.cos(position * div_term))
    return pe


def init_params(key, *, c_in, d_model, n_heads, dff, num_layers, seq_len,
                num_classes):
    scale = 0.05
    keys = iter(jax.random.split(key, 2 + 6 * num_layers))

    params = {
        "proj_w": jax.random.normal(next(keys), (c_in, d_model), jnp.float32) * scale,
        "proj_b": jnp.zeros((d_model,), jnp.float32),
        "layers": [],
        "out_w": jax.random.normal(next(keys), (seq_len * d_model, num_classes),
                                   jnp.float32) * scale,
        "out_b": jnp.zeros((num_classes,), jnp.float32),
    }
    for _ in range(num_layers):
        layer = {
            "wq": jax.random.normal(next(keys), (d_model, d_model), jnp.float32) * scale,
            "wk": jax.random.normal(next(keys), (d_model, d_model), jnp.float32) * scale,
            "wv": jax.random.normal(next(keys), (d_model, d_model), jnp.float32) * scale,
            "wo": jax.random.normal(next(keys), (d_model, d_model), jnp.float32) * scale,
            "bq": jnp.zeros((d_model,), jnp.float32),
            "bk": jnp.zeros((d_model,), jnp.float32),
            "bv": jnp.zeros((d_model,), jnp.float32),
            "bo": jnp.zeros((d_model,), jnp.float32),
            "g1": jnp.ones((d_model,), jnp.float32),
            "be1": jnp.zeros((d_model,), jnp.float32),
            "w1": jax.random.normal(next(keys), (d_model, dff), jnp.float32) * scale,
            "b1": jnp.zeros((dff,), jnp.float32),
            "w2": jax.random.normal(next(keys), (dff, d_model), jnp.float32) * scale,
            "b2": jnp.zeros((d_model,), jnp.float32),
            "g2": jnp.ones((d_model,), jnp.float32),
            "be2": jnp.zeros((d_model,), jnp.float32),
        }
        params["layers"].append(layer)
    return params


def pack_params(params, *, seq_len, d_model, n_heads, dff, num_classes):
    H = n_heads
    hd = d_model // H
    q_scale = 1.0 / math.sqrt(hd)     # fold attention scale into q weights/bias
    sqrt_d = math.sqrt(d_model)       # fold *sqrt(D) into the input projection
    nc_pad = max(8, ((num_classes + 7) // 8) * 8)

    wqkv, bqkv, wo, w1, b1, w2, lvec = [], [], [], [], [], [], []
    for lyr in params["layers"]:
        wqkv.append(jnp.concatenate(
            [lyr["wq"] * q_scale, lyr["wk"], lyr["wv"]], axis=1))       # (D, 3D)
        bqkv.append(jnp.concatenate(
            [lyr["bq"] * q_scale, lyr["bk"], lyr["bv"]]).reshape(1, 3 * d_model))
        wo.append(lyr["wo"])                                            # (D, D)
        w1.append(lyr["w1"])
        b1.append(lyr["b1"].reshape(1, dff))
        w2.append(lyr["w2"])
        lvec.append(jnp.stack([lyr["bo"], lyr["g1"], lyr["be1"],
                               lyr["b2"], lyr["g2"], lyr["be2"]]))

    pe = fixed_positional_encoding(seq_len, d_model)
    ow = jnp.pad(params["out_w"], ((0, 0), (0, nc_pad - num_classes)))  # (S*D, ncp)
    ob = jnp.pad(params["out_b"], (0, nc_pad - num_classes)).reshape(1, nc_pad)

    return {
        "pw": params["proj_w"] * sqrt_d,                    # (C, D)
        "pb": (params["proj_b"] * sqrt_d).reshape(1, d_model),
        "pe": pe,                                           # (S, D)
        "wqkv": jnp.stack(wqkv),                            # (L, D, 3D)
        "bqkv": jnp.stack(bqkv),                            # (L, 1, 3D)
        "wo": jnp.stack(wo),                                # (L, D, D)
        "w1": jnp.stack(w1),                                # (L, D, F)
        "b1": jnp.stack(b1),                                # (L, 1, F)
        "w2": jnp.stack(w2),                                # (L, F, D)
        "lvec": jnp.stack(lvec),                            # (L, 6, D)
        "ow": ow,                                           # (S*D, nc_pad)
        "ob": ob,                                           # (1, nc_pad)
    }


# -----------------------------------------------------------------------------
# Pure-JAX reference (mirrors the PyTorch module in eval mode)
# -----------------------------------------------------------------------------
def reference_forward(x, params, *, d_model, n_heads, eps=1e-5):
    B, S, _ = x.shape
    H = n_heads
    hd = d_model // H
    pe = fixed_positional_encoding(S, d_model)
    h = (x @ params["proj_w"] + params["proj_b"]) * math.sqrt(d_model) + pe[None]

    def ln(t, g, b):
        mu = t.mean(-1, keepdims=True)
        var = ((t - mu) ** 2).mean(-1, keepdims=True)
        return (t - mu) / jnp.sqrt(var + eps) * g + b

    for lyr in params["layers"]:
        q = (h @ lyr["wq"] + lyr["bq"]).reshape(B, S, H, hd).transpose(0, 2, 1, 3)
        k = (h @ lyr["wk"] + lyr["bk"]).reshape(B, S, H, hd).transpose(0, 2, 1, 3)
        v = (h @ lyr["wv"] + lyr["bv"]).reshape(B, S, H, hd).transpose(0, 2, 1, 3)
        sc = jnp.einsum('bhqd,bhkd->bhqk', q, k) / math.sqrt(hd)
        p = jax.nn.softmax(sc, axis=-1)
        o = jnp.einsum('bhqk,bhkd->bhqd', p, v).transpose(0, 2, 1, 3)
        o = o.reshape(B, S, d_model)
        attn = o @ lyr["wo"] + lyr["bo"]
        h = ln(h + attn, lyr["g1"], lyr["be1"])
        ff = jnp.maximum(h @ lyr["w1"] + lyr["b1"], 0.0) @ lyr["w2"] + lyr["b2"]
        h = ln(h + ff, lyr["g2"], lyr["be2"])
    y = jnp.maximum(h, 0.0).reshape(B, S * d_model)
    return y @ params["out_w"] + params["out_b"]


# -----------------------------------------------------------------------------
if __name__ == "__main__":
    B, S, C_IN = 2, 8, 4
    D_MODEL, N_HEADS, DFF, N_LAYERS, N_CLS = 32, 4, 64, 2, 3

    key = jax.random.PRNGKey(0)
    k_params, k_x = jax.random.split(key)

    params = init_params(k_params, c_in=C_IN, d_model=D_MODEL, n_heads=N_HEADS,
                         dff=DFF, num_layers=N_LAYERS, seq_len=S,
                         num_classes=N_CLS)
    packed = pack_params(params, seq_len=S, d_model=D_MODEL, n_heads=N_HEADS,
                         dff=DFF, num_classes=N_CLS)
    x = jax.random.normal(k_x, (B, S, C_IN), jnp.float32)

    out = tst_forward(x, packed, B=B, S=S, C=C_IN, D=D_MODEL, H=N_HEADS,
                      F=DFF, L=N_LAYERS, num_classes=N_CLS)
    out = jax.block_until_ready(out)

    ref = jax.block_until_ready(
        reference_forward(x, params, d_model=D_MODEL, n_heads=N_HEADS))

    assert out.shape == (B, N_CLS), out.shape
    assert bool(jnp.all(jnp.isfinite(out)))
    assert bool(jnp.allclose(out, ref, rtol=1e-4, atol=1e-4)), (out, ref)
    print("KERNEL_OK")
</pallas_src>

<mosaic_0001>
module attributes {stable_mosaic.version = 11 : i64} {
  func.func @_fused_tst_kernel(%arg0: memref<2x8x4xf32, #tpu.memory_space<vmem>>, %arg1: memref<4x32xf32, #tpu.memory_space<vmem>>, %arg2: memref<1x32xf32, #tpu.memory_space<vmem>>, %arg3: memref<8x32xf32, #tpu.memory_space<vmem>>, %arg4: memref<2x32x96xf32, #tpu.memory_space<vmem>>, %arg5: memref<2x1x96xf32, #tpu.memory_space<vmem>>, %arg6: memref<2x32x32xf32, #tpu.memory_space<vmem>>, %arg7: memref<2x32x64xf32, #tpu.memory_space<vmem>>, %arg8: memref<2x1x64xf32, #tpu.memory_space<vmem>>, %arg9: memref<2x64x32xf32, #tpu.memory_space<vmem>>, %arg10: memref<2x6x32xf32, #tpu.memory_space<vmem>>, %arg11: memref<256x8xf32, #tpu.memory_space<vmem>>, %arg12: memref<1x8xf32, #tpu.memory_space<vmem>>, %arg13: memref<8x8xf32, #tpu.memory_space<vmem>>) attributes {dimension_semantics = [], scalar_prefetch = 0 : i64, scratch_operands = 0 : i64, tpu.core_type = #tpu.core_type<tc>} {
    %c0 = arith.constant 0 : index
    %c0_0 = arith.constant 0 : index
    %c0_1 = arith.constant 0 : index
    %0 = vector.load %arg0[%c0, %c0_0, %c0_1] : memref<2x8x4xf32, #tpu.memory_space<vmem>>, vector<2x8x4xf32>
    %1 = vector.shape_cast %0 : vector<2x8x4xf32> to vector<16x4xf32>
    %c0_2 = arith.constant 0 : index
    %c0_3 = arith.constant 0 : index
    %2 = vector.load %arg1[%c0_2, %c0_3] : memref<4x32xf32, #tpu.memory_space<vmem>>, vector<4x32xf32>
    %cst = arith.constant dense<0.000000e+00> : vector<16x32xf32>
    %3 = tpu.matmul %1, %2, %cst {dimension_numbers = #tpu.dot_dimension_numbers<[1], [0], [0], [1], [0, 0, 1, 1], [], []>} : vector<16x4xf32>, vector<4x32xf32>, vector<16x32xf32> -> vector<16x32xf32>
    %c0_4 = arith.constant 0 : index
    %c0_5 = arith.constant 0 : index
    %4 = vector.load %arg2[%c0_4, %c0_5] : memref<1x32xf32, #tpu.memory_space<vmem>>, vector<1x32xf32>
    %5 = vector.broadcast %4 : vector<1x32xf32> to vector<16x32xf32>
    %6 = arith.addf %3, %5 : vector<16x32xf32>
    %7 = vector.shape_cast %6 : vector<16x32xf32> to vector<2x8x32xf32>
    %c0_6 = arith.constant 0 : index
    %c0_7 = arith.constant 0 : index
    %8 = vector.load %arg3[%c0_6, %c0_7] : memref<8x32xf32, #tpu.memory_space<vmem>>, vector<8x32xf32>
    %9 = vector.shape_cast %8 : vector<8x32xf32> to vector<1x8x32xf32>
    %10 = vector.broadcast %9 : vector<1x8x32xf32> to vector<2x8x32xf32>
    %11 = arith.addf %7, %10 : vector<2x8x32xf32>
    %12 = vector.shape_cast %11 : vector<2x8x32xf32> to vector<16x32xf32>
    %c0_8 = arith.constant 0 : index
    %c0_9 = arith.constant 0 : index
    %c0_10 = arith.constant 0 : index
    %13 = vector.load %arg10[%c0_8, %c0_9, %c0_10] : memref<2x6x32xf32, #tpu.memory_space<vmem>>, vector<1x6x32xf32>
    %14 = vector.shape_cast %13 : vector<1x6x32xf32> to vector<6x32xf32>
    %c0_11 = arith.constant 0 : index
    %c0_12 = arith.constant 0 : index
    %c0_13 = arith.constant 0 : index
    %15 = vector.load %arg4[%c0_11, %c0_12, %c0_13] : memref<2x32x96xf32, #tpu.memory_space<vmem>>, vector<1x32x96xf32>
    %16 = vector.shape_cast %15 : vector<1x32x96xf32> to vector<32x96xf32>
    %cst_14 = arith.constant dense<0.000000e+00> : vector<16x96xf32>
    %17 = tpu.matmul %12, %16, %cst_14 {dimension_numbers = #tpu.dot_dimension_numbers<[1], [0], [0], [1], [0, 0, 1, 1], [], []>} : vector<16x32xf32>, vector<32x96xf32>, vector<16x96xf32> -> vector<16x96xf32>
    %c0_15 = arith.constant 0 : index
    %c0_16 = arith.constant 0 : index
    %c0_17 = arith.constant 0 : index
    %18 = vector.load %arg5[%c0_15, %c0_16, %c0_17] : memref<2x1x96xf32, #tpu.memory_space<vmem>>, vector<1x1x96xf32>
    %19 = vector.shape_cast %18 : vector<1x1x96xf32> to vector<1x96xf32>
    %20 = vector.broadcast %19 : vector<1x96xf32> to vector<16x96xf32>
    %21 = arith.addf %17, %20 : vector<16x96xf32>
    %22 = vector.shape_cast %21 : vector<16x96xf32> to vector<2x8x96xf32>
    %23 = vector.extract_strided_slice %22 {offsets = [0, 0, 0], sizes = [2, 8, 8], strides = [1, 1, 1]} : vector<2x8x96xf32> to vector<2x8x8xf32>
    %24 = vector.extract_strided_slice %22 {offsets = [0, 0, 8], sizes = [2, 8, 8], strides = [1, 1, 1]} : vector<2x8x96xf32> to vector<2x8x8xf32>
    %25 = vector.extract_strided_slice %22 {offsets = [0, 0, 16], sizes = [2, 8, 8], strides = [1, 1, 1]} : vector<2x8x96xf32> to vector<2x8x8xf32>
    %26 = vector.extract_strided_slice %22 {offsets = [0, 0, 24], sizes = [2, 8, 8], strides = [1, 1, 1]} : vector<2x8x96xf32> to vector<2x8x8xf32>
    %27 = tpu.concatenate %23, %24, %25, %26 in 0 : vector<2x8x8xf32>, vector<2x8x8xf32>, vector<2x8x8xf32>, vector<2x8x8xf32> -> vector<8x8x8xf32>
    %28 = vector.extract_strided_slice %22 {offsets = [0, 0, 32], sizes = [2, 8, 8], strides = [1, 1, 1]} : vector<2x8x96xf32> to vector<2x8x8xf32>
    %29 = vector.extract_strided_slice %22 {offsets = [0, 0, 40], sizes = [2, 8, 8], strides = [1, 1, 1]} : vector<2x8x96xf32> to vector<2x8x8xf32>
    %30 = vector.extract_strided_slice %22 {offsets = [0, 0, 48], sizes = [2, 8, 8], strides = [1, 1, 1]} : vector<2x8x96xf32> to vector<2x8x8xf32>
    %31 = vector.extract_strided_slice %22 {offsets = [0, 0, 56], sizes = [2, 8, 8], strides = [1, 1, 1]} : vector<2x8x96xf32> to vector<2x8x8xf32>
    %32 = tpu.concatenate %28, %29, %30, %31 in 0 : vector<2x8x8xf32>, vector<2x8x8xf32>, vector<2x8x8xf32>, vector<2x8x8xf32> -> vector<8x8x8xf32>
    %33 = vector.extract_strided_slice %22 {offsets = [0, 0, 64], sizes = [2, 8, 8], strides = [1, 1, 1]} : vector<2x8x96xf32> to vector<2x8x8xf32>
    %34 = vector.extract_strided_slice %22 {offsets = [0, 0, 72], sizes = [2, 8, 8], strides = [1, 1, 1]} : vector<2x8x96xf32> to vector<2x8x8xf32>
    %35 = vector.extract_strided_slice %22 {offsets = [0, 0, 80], sizes = [2, 8, 8], strides = [1, 1, 1]} : vector<2x8x96xf32> to vector<2x8x8xf32>
    %36 = vector.extract_strided_slice %22 {offsets = [0, 0, 88], sizes = [2, 8, 8], strides = [1, 1, 1]} : vector<2x8x96xf32> to vector<2x8x8xf32>
    %37 = tpu.concatenate %33, %34, %35, %36 in 0 : vector<2x8x8xf32>, vector<2x8x8xf32>, vector<2x8x8xf32>, vector<2x8x8xf32> -> vector<8x8x8xf32>
    "tpu.trace_start"() <{level = 10 : i32, message = "bqd,bkd->bqk"}> : () -> ()
    %cst_18 = arith.constant dense<0.000000e+00> : vector<8x8x8xf32>
    %38 = tpu.matmul %27, %32, %cst_18 {dimension_numbers = #tpu.dot_dimension_numbers<[2], [2], [1], [1], [0, 0, 0, 1, 1, 1], [0], [0]>} : vector<8x8x8xf32>, vector<8x8x8xf32>, vector<8x8x8xf32> -> vector<8x8x8xf32>
    "tpu.trace_stop"() : () -> ()
    %cst_19 = arith.constant dense<0xFF800000> : vector<8x8xf32>
    %39 = vector.multi_reduction <maximumf>, %38, %cst_19 [2] : vector<8x8x8xf32> to vector<8x8xf32>
    %40 = vector.shape_cast %39 : vector<8x8xf32> to vector<8x8x1xf32>
    %41 = vector.broadcast %40 : vector<8x8x1xf32> to vector<8x8x8xf32>
    %42 = arith.subf %38, %41 : vector<8x8x8xf32>
    %43 = math.exp %42 : vector<8x8x8xf32>
    %cst_20 = arith.constant dense<0.000000e+00> : vector<8x8xf32>
    %44 = vector.multi_reduction <add>, %43, %cst_20 [2] : vector<8x8x8xf32> to vector<8x8xf32>
    %45 = vector.shape_cast %44 : vector<8x8xf32> to vector<8x8x1xf32>
    %46 = vector.broadcast %45 : vector<8x8x1xf32> to vector<8x8x8xf32>
    %47 = arith.divf %43, %46 : vector<8x8x8xf32>
    "tpu.trace_start"() <{level = 10 : i32, message = "bqk,bkd->bqd"}> : () -> ()
    %cst_21 = arith.constant dense<0.000000e+00> : vector<8x8x8xf32>
    %48 = tpu.matmul %47, %37, %cst_21 {dimension_numbers = #tpu.dot_dimension_numbers<[2], [1], [1], [2], [0, 0, 0, 1, 1, 2], [0], [0]>} : vector<8x8x8xf32>, vector<8x8x8xf32>, vector<8x8x8xf32> -> vector<8x8x8xf32>
    "tpu.trace_stop"() : () -> ()
    %49 = vector.extract_strided_slice %48 {offsets = [0, 0, 0], sizes = [2, 8, 8], strides = [1, 1, 1]} : vector<8x8x8xf32> to vector<2x8x8xf32>
    %50 = vector.extract_strided_slice %48 {offsets = [2, 0, 0], sizes = [2, 8, 8], strides = [1, 1, 1]} : vector<8x8x8xf32> to vector<2x8x8xf32>
    %51 = vector.extract_strided_slice %48 {offsets = [4, 0, 0], sizes = [2, 8, 8], strides = [1, 1, 1]} : vector<8x8x8xf32> to vector<2x8x8xf32>
    %52 = vector.extract_strided_slice %48 {offsets = [6, 0, 0], sizes = [2, 8, 8], strides = [1, 1, 1]} : vector<8x8x8xf32> to vector<2x8x8xf32>
    %53 = tpu.concatenate %49, %50, %51, %52 in 2 : vector<2x8x8xf32>, vector<2x8x8xf32>, vector<2x8x8xf32>, vector<2x8x8xf32> -> vector<2x8x32xf32>
    %54 = vector.shape_cast %53 : vector<2x8x32xf32> to vector<16x32xf32>
    %c0_22 = arith.constant 0 : index
    %c0_23 = arith.constant 0 : index
    %c0_24 = arith.constant 0 : index
    %55 = vector.load %arg6[%c0_22, %c0_23, %c0_24] : memref<2x32x32xf32, #tpu.memory_space<vmem>>, vector<1x32x32xf32>
    %56 = vector.shape_cast %55 : vector<1x32x32xf32> to vector<32x32xf32>
    %cst_25 = arith.constant dense<0.000000e+00> : vector<16x32xf32>
    %57 = tpu.matmul %54, %56, %cst_25 {dimension_numbers = #tpu.dot_dimension_numbers<[1], [0], [0], [1], [0, 0, 1, 1], [], []>} : vector<16x32xf32>, vector<32x32xf32>, vector<16x32xf32> -> vector<16x32xf32>
    %58 = vector.extract_strided_slice %14 {offsets = [0, 0], sizes = [1, 32], strides = [1, 1]} : vector<6x32xf32> to vector<1x32xf32>
    %59 = vector.broadcast %58 : vector<1x32xf32> to vector<16x32xf32>
    %60 = arith.addf %57, %59 : vector<16x32xf32>
    %61 = arith.addf %12, %60 : vector<16x32xf32>
    %62 = vector.extract_strided_slice %14 {offsets = [1, 0], sizes = [1, 32], strides = [1, 1]} : vector<6x32xf32> to vector<1x32xf32>
    %63 = vector.extract_strided_slice %14 {offsets = [2, 0], sizes = [1, 32], strides = [1, 1]} : vector<6x32xf32> to vector<1x32xf32>
    %cst_26 = arith.constant dense<0.000000e+00> : vector<16xf32>
    %64 = vector.multi_reduction <add>, %61, %cst_26 [1] : vector<16x32xf32> to vector<16xf32>
    %65 = vector.shape_cast %64 : vector<16xf32> to vector<16x1xf32>
    %cst_27 = arith.constant 3.200000e+01 : f32
    %66 = vector.broadcast %cst_27 : f32 to vector<16x1xf32>
    %67 = arith.divf %65, %66 : vector<16x1xf32>
    %68 = vector.broadcast %67 : vector<16x1xf32> to vector<16x32xf32>
    %69 = arith.subf %61, %68 : vector<16x32xf32>
    %70 = arith.mulf %69, %69 : vector<16x32xf32>
    %cst_28 = arith.constant dense<0.000000e+00> : vector<16xf32>
    %71 = vector.multi_reduction <add>, %70, %cst_28 [1] : vector<16x32xf32> to vector<16xf32>
    %72 = vector.shape_cast %71 : vector<16xf32> to vector<16x1xf32>
    %cst_29 = arith.constant 3.200000e+01 : f32
    %73 = vector.broadcast %cst_29 : f32 to vector<16x1xf32>
    %74 = arith.divf %72, %73 : vector<16x1xf32>
    %75 = vector.broadcast %67 : vector<16x1xf32> to vector<16x32xf32>
    %76 = arith.subf %61, %75 : vector<16x32xf32>
    %cst_30 = arith.constant 9.99999974E-6 : f32
    %77 = vector.broadcast %cst_30 : f32 to vector<16x1xf32>
    %78 = arith.addf %74, %77 : vector<16x1xf32>
    %79 = math.rsqrt %78 : vector<16x1xf32>
    %80 = vector.broadcast %79 : vector<16x1xf32> to vector<16x32xf32>
    %81 = arith.mulf %76, %80 : vector<16x32xf32>
    %82 = vector.broadcast %62 : vector<1x32xf32> to vector<16x32xf32>
    %83 = arith.mulf %81, %82 : vector<16x32xf32>
    %84 = vector.broadcast %63 : vector<1x32xf32> to vector<16x32xf32>
    %85 = arith.addf %83, %84 : vector<16x32xf32>
    %c0_31 = arith.constant 0 : index
    %c0_32 = arith.constant 0 : index
    %c0_33 = arith.constant 0 : index
    %86 = vector.load %arg7[%c0_31, %c0_32, %c0_33] : memref<2x32x64xf32, #tpu.memory_space<vmem>>, vector<1x32x64xf32>
    %87 = vector.shape_cast %86 : vector<1x32x64xf32> to vector<32x64xf32>
    %cst_34 = arith.constant dense<0.000000e+00> : vector<16x64xf32>
    %88 = tpu.matmul %85, %87, %cst_34 {dimension_numbers = #tpu.dot_dimension_numbers<[1], [0], [0], [1], [0, 0, 1, 1], [], []>} : vector<16x32xf32>, vector<32x64xf32>, vector<16x64xf32> -> vector<16x64xf32>
    %c0_35 = arith.constant 0 : index
    %c0_36 = arith.constant 0 : index
    %c0_37 = arith.constant 0 : index
    %89 = vector.load %arg8[%c0_35, %c0_36, %c0_37] : memref<2x1x64xf32, #tpu.memory_space<vmem>>, vector<1x1x64xf32>
    %90 = vector.shape_cast %89 : vector<1x1x64xf32> to vector<1x64xf32>
    %91 = vector.broadcast %90 : vector<1x64xf32> to vector<16x64xf32>
    %92 = arith.addf %88, %91 : vector<16x64xf32>
    %cst_38 = arith.constant 0.000000e+00 : f32
    %93 = vector.broadcast %cst_38 : f32 to vector<16x64xf32>
    %94 = arith.maximumf %92, %93 : vector<16x64xf32>
    %c0_39 = arith.constant 0 : index
    %c0_40 = arith.constant 0 : index
    %c0_41 = arith.constant 0 : index
    %95 = vector.load %arg9[%c0_39, %c0_40, %c0_41] : memref<2x64x32xf32, #tpu.memory_space<vmem>>, vector<1x64x32xf32>
    %96 = vector.shape_cast %95 : vector<1x64x32xf32> to vector<64x32xf32>
    %cst_42 = arith.constant dense<0.000000e+00> : vector<16x32xf32>
    %97 = tpu.matmul %94, %96, %cst_42 {dimension_numbers = #tpu.dot_dimension_numbers<[1], [0], [0], [1], [0, 0, 1, 1], [], []>} : vector<16x64xf32>, vector<64x32xf32>, vector<16x32xf32> -> vector<16x32xf32>
    %98 = vector.extract_strided_slice %14 {offsets = [3, 0], sizes = [1, 32], strides = [1, 1]} : vector<6x32xf32> to vector<1x32xf32>
    %99 = vector.broadcast %98 : vector<1x32xf32> to vector<16x32xf32>
    %100 = arith.addf %97, %99 : vector<16x32xf32>
    %101 = arith.addf %85, %100 : vector<16x32xf32>
    %102 = vector.extract_strided_slice %14 {offsets = [4, 0], sizes = [1, 32], strides = [1, 1]} : vector<6x32xf32> to vector<1x32xf32>
    %103 = vector.extract_strided_slice %14 {offsets = [5, 0], sizes = [1, 32], strides = [1, 1]} : vector<6x32xf32> to vector<1x32xf32>
    %cst_43 = arith.constant dense<0.000000e+00> : vector<16xf32>
    %104 = vector.multi_reduction <add>, %101, %cst_43 [1] : vector<16x32xf32> to vector<16xf32>
    %105 = vector.shape_cast %104 : vector<16xf32> to vector<16x1xf32>
    %cst_44 = arith.constant 3.200000e+01 : f32
    %106 = vector.broadcast %cst_44 : f32 to vector<16x1xf32>
    %107 = arith.divf %105, %106 : vector<16x1xf32>
    %108 = vector.broadcast %107 : vector<16x1xf32> to vector<16x32xf32>
    %109 = arith.subf %101, %108 : vector<16x32xf32>
    %110 = arith.mulf %109, %109 : vector<16x32xf32>
    %cst_45 = arith.constant dense<0.000000e+00> : vector<16xf32>
    %111 = vector.multi_reduction <add>, %110, %cst_45 [1] : vector<16x32xf32> to vector<16xf32>
    %112 = vector.shape_cast %111 : vector<16xf32> to vector<16x1xf32>
    %cst_46 = arith.constant 3.200000e+01 : f32
    %113 = vector.broadcast %cst_46 : f32 to vector<16x1xf32>
    %114 = arith.divf %112, %113 : vector<16x1xf32>
    %115 = vector.broadcast %107 : vector<16x1xf32> to vector<16x32xf32>
    %116 = arith.subf %101, %115 : vector<16x32xf32>
    %cst_47 = arith.constant 9.99999974E-6 : f32
    %117 = vector.broadcast %cst_47 : f32 to vector<16x1xf32>
    %118 = arith.addf %114, %117 : vector<16x1xf32>
    %119 = math.rsqrt %118 : vector<16x1xf32>
    %120 = vector.broadcast %119 : vector<16x1xf32> to vector<16x32xf32>
    %121 = arith.mulf %116, %120 : vector<16x32xf32>
    %122 = vector.broadcast %102 : vector<1x32xf32> to vector<16x32xf32>
    %123 = arith.mulf %121, %122 : vector<16x32xf32>
    %124 = vector.broadcast %103 : vector<1x32xf32> to vector<16x32xf32>
    %125 = arith.addf %123, %124 : vector<16x32xf32>
    %c1 = arith.constant 1 : index
    %c0_48 = arith.constant 0 : index
    %c0_49 = arith.constant 0 : index
    %126 = vector.load %arg10[%c1, %c0_48, %c0_49] : memref<2x6x32xf32, #tpu.memory_space<vmem>>, vector<1x6x32xf32>
    %127 = vector.shape_cast %126 : vector<1x6x32xf32> to vector<6x32xf32>
    %c1_50 = arith.constant 1 : index
    %c0_51 = arith.constant 0 : index
    %c0_52 = arith.constant 0 : index
    %128 = vector.load %arg4[%c1_50, %c0_51, %c0_52] : memref<2x32x96xf32, #tpu.memory_space<vmem>>, vector<1x32x96xf32>
    %129 = vector.shape_cast %128 : vector<1x32x96xf32> to vector<32x96xf32>
    %cst_53 = arith.constant dense<0.000000e+00> : vector<16x96xf32>
    %130 = tpu.matmul %125, %129, %cst_53 {dimension_numbers = #tpu.dot_dimension_numbers<[1], [0], [0], [1], [0, 0, 1, 1], [], []>} : vector<16x32xf32>, vector<32x96xf32>, vector<16x96xf32> -> vector<16x96xf32>
    %c1_54 = arith.constant 1 : index
    %c0_55 = arith.constant 0 : index
    %c0_56 = arith.constant 0 : index
    %131 = vector.load %arg5[%c1_54, %c0_55, %c0_56] : memref<2x1x96xf32, #tpu.memory_space<vmem>>, vector<1x1x96xf32>
    %132 = vector.shape_cast %131 : vector<1x1x96xf32> to vector<1x96xf32>
    %133 = vector.broadcast %132 : vector<1x96xf32> to vector<16x96xf32>
    %134 = arith.addf %130, %133 : vector<16x96xf32>
    %135 = vector.shape_cast %134 : vector<16x96xf32> to vector<2x8x96xf32>
    %136 = vector.extract_strided_slice %135 {offsets = [0, 0, 0], sizes = [2, 8, 8], strides = [1, 1, 1]} : vector<2x8x96xf32> to vector<2x8x8xf32>
    %137 = vector.extract_strided_slice %135 {offsets = [0, 0, 8], sizes = [2, 8, 8], strides = [1, 1, 1]} : vector<2x8x96xf32> to vector<2x8x8xf32>
    %138 = vector.extract_strided_slice %135 {offsets = [0, 0, 16], sizes = [2, 8, 8], strides = [1, 1, 1]} : vector<2x8x96xf32> to vector<2x8x8xf32>
    %139 = vector.extract_strided_slice %135 {offsets = [0, 0, 24], sizes = [2, 8, 8], strides = [1, 1, 1]} : vector<2x8x96xf32> to vector<2x8x8xf32>
    %140 = tpu.concatenate %136, %137, %138, %139 in 0 : vector<2x8x8xf32>, vector<2x8x8xf32>, vector<2x8x8xf32>, vector<2x8x8xf32> -> vector<8x8x8xf32>
    %141 = vector.extract_strided_slice %135 {offsets = [0, 0, 32], sizes = [2, 8, 8], strides = [1, 1, 1]} : vector<2x8x96xf32> to vector<2x8x8xf32>
    %142 = vector.extract_strided_slice %135 {offsets = [0, 0, 40], sizes = [2, 8, 8], strides = [1, 1, 1]} : vector<2x8x96xf32> to vector<2x8x8xf32>
    %143 = vector.extract_strided_slice %135 {offsets = [0, 0, 48], sizes = [2, 8, 8], strides = [1, 1, 1]} : vector<2x8x96xf32> to vector<2x8x8xf32>
    %144 = vector.extract_strided_slice %135 {offsets = [0, 0, 56], sizes = [2, 8, 8], strides = [1, 1, 1]} : vector<2x8x96xf32> to vector<2x8x8xf32>
    %145 = tpu.concatenate %141, %142, %143, %144 in 0 : vector<2x8x8xf32>, vector<2x8x8xf32>, vector<2x8x8xf32>, vector<2x8x8xf32> -> vector<8x8x8xf32>
    %146 = vector.extract_strided_slice %135 {offsets = [0, 0, 64], sizes = [2, 8, 8], strides = [1, 1, 1]} : vector<2x8x96xf32> to vector<2x8x8xf32>
    %147 = vector.extract_strided_slice %135 {offsets = [0, 0, 72], sizes = [2, 8, 8], strides = [1, 1, 1]} : vector<2x8x96xf32> to vector<2x8x8xf32>
    %148 = vector.extract_strided_slice %135 {offsets = [0, 0, 80], sizes = [2, 8, 8], strides = [1, 1, 1]} : vector<2x8x96xf32> to vector<2x8x8xf32>
    %149 = vector.extract_strided_slice %135 {offsets = [0, 0, 88], sizes = [2, 8, 8], strides = [1, 1, 1]} : vector<2x8x96xf32> to vector<2x8x8xf32>
    %150 = tpu.concatenate %146, %147, %148, %149 in 0 : vector<2x8x8xf32>, vector<2x8x8xf32>, vector<2x8x8xf32>, vector<2x8x8xf32> -> vector<8x8x8xf32>
    "tpu.trace_start"() <{level = 10 : i32, message = "bqd,bkd->bqk"}> : () -> ()
    %cst_57 = arith.constant dense<0.000000e+00> : vector<8x8x8xf32>
    %151 = tpu.matmul %140, %145, %cst_57 {dimension_numbers = #tpu.dot_dimension_numbers<[2], [2], [1], [1], [0, 0, 0, 1, 1, 1], [0], [0]>} : vector<8x8x8xf32>, vector<8x8x8xf32>, vector<8x8x8xf32> -> vector<8x8x8xf32>
    "tpu.trace_stop"() : () -> ()
    %cst_58 = arith.constant dense<0xFF800000> : vector<8x8xf32>
    %152 = vector.multi_reduction <maximumf>, %151, %cst_58 [2] : vector<8x8x8xf32> to vector<8x8xf32>
    %153 = vector.shape_cast %152 : vector<8x8xf32> to vector<8x8x1xf32>
    %154 = vector.broadcast %153 : vector<8x8x1xf32> to vector<8x8x8xf32>
    %155 = arith.subf %151, %154 : vector<8x8x8xf32>
    %156 = math.exp %155 : vector<8x8x8xf32>
    %cst_59 = arith.constant dense<0.000000e+00> : vector<8x8xf32>
    %157 = vector.multi_reduction <add>, %156, %cst_59 [2] : vector<8x8x8xf32> to vector<8x8xf32>
    %158 = vector.shape_cast %157 : vector<8x8xf32> to vector<8x8x1xf32>
    %159 = vector.broadcast %158 : vector<8x8x1xf32> to vector<8x8x8xf32>
    %160 = arith.divf %156, %159 : vector<8x8x8xf32>
    "tpu.trace_start"() <{level = 10 : i32, message = "bqk,bkd->bqd"}> : () -> ()
    %cst_60 = arith.constant dense<0.000000e+00> : vector<8x8x8xf32>
    %161 = tpu.matmul %160, %150, %cst_60 {dimension_numbers = #tpu.dot_dimension_numbers<[2], [1], [1], [2], [0, 0, 0, 1, 1, 2], [0], [0]>} : vector<8x8x8xf32>, vector<8x8x8xf32>, vector<8x8x8xf32> -> vector<8x8x8xf32>
    "tpu.trace_stop"() : () -> ()
    %162 = vector.extract_strided_slice %161 {offsets = [0, 0, 0], sizes = [2, 8, 8], strides = [1, 1, 1]} : vector<8x8x8xf32> to vector<2x8x8xf32>
    %163 = vector.extract_strided_slice %161 {offsets = [2, 0, 0], sizes = [2, 8, 8], strides = [1, 1, 1]} : vector<8x8x8xf32> to vector<2x8x8xf32>
    %164 = vector.extract_strided_slice %161 {offsets = [4, 0, 0], sizes = [2, 8, 8], strides = [1, 1, 1]} : vector<8x8x8xf32> to vector<2x8x8xf32>
    %165 = vector.extract_strided_slice %161 {offsets = [6, 0, 0], sizes = [2, 8, 8], strides = [1, 1, 1]} : vector<8x8x8xf32> to vector<2x8x8xf32>
    %166 = tpu.concatenate %162, %163, %164, %165 in 2 : vector<2x8x8xf32>, vector<2x8x8xf32>, vector<2x8x8xf32>, vector<2x8x8xf32> -> vector<2x8x32xf32>
    %167 = vector.shape_cast %166 : vector<2x8x32xf32> to vector<16x32xf32>
    %c1_61 = arith.constant 1 : index
    %c0_62 = arith.constant 0 : index
    %c0_63 = arith.constant 0 : index
    %168 = vector.load %arg6[%c1_61, %c0_62, %c0_63] : memref<2x32x32xf32, #tpu.memory_space<vmem>>, vector<1x32x32xf32>
    %169 = vector.shape_cast %168 : vector<1x32x32xf32> to vector<32x32xf32>
    %cst_64 = arith.constant dense<0.000000e+00> : vector<16x32xf32>
    %170 = tpu.matmul %167, %169, %cst_64 {dimension_numbers = #tpu.dot_dimension_numbers<[1], [0], [0], [1], [0, 0, 1, 1], [], []>} : vector<16x32xf32>, vector<32x32xf32>, vector<16x32xf32> -> vector<16x32xf32>
    %171 = vector.extract_strided_slice %127 {offsets = [0, 0], sizes = [1, 32], strides = [1, 1]} : vector<6x32xf32> to vector<1x32xf32>
    %172 = vector.broadcast %171 : vector<1x32xf32> to vector<16x32xf32>
    %173 = arith.addf %170, %172 : vector<16x32xf32>
    %174 = arith.addf %125, %173 : vector<16x32xf32>
    %175 = vector.extract_strided_slice %127 {offsets = [1, 0], sizes = [1, 32], strides = [1, 1]} : vector<6x32xf32> to vector<1x32xf32>
    %176 = vector.extract_strided_slice %127 {offsets = [2, 0], sizes = [1, 32], strides = [1, 1]} : vector<6x32xf32> to vector<1x32xf32>
    %cst_65 = arith.constant dense<0.000000e+00> : vector<16xf32>
    %177 = vector.multi_reduction <add>, %174, %cst_65 [1] : vector<16x32xf32> to vector<16xf32>
    %178 = vector.shape_cast %177 : vector<16xf32> to vector<16x1xf32>
    %cst_66 = arith.constant 3.200000e+01 : f32
    %179 = vector.broadcast %cst_66 : f32 to vector<16x1xf32>
    %180 = arith.divf %178, %179 : vector<16x1xf32>
    %181 = vector.broadcast %180 : vector<16x1xf32> to vector<16x32xf32>
    %182 = arith.subf %174, %181 : vector<16x32xf32>
    %183 = arith.mulf %182, %182 : vector<16x32xf32>
    %cst_67 = arith.constant dense<0.000000e+00> : vector<16xf32>
    %184 = vector.multi_reduction <add>, %183, %cst_67 [1] : vector<16x32xf32> to vector<16xf32>
    %185 = vector.shape_cast %184 : vector<16xf32> to vector<16x1xf32>
    %cst_68 = arith.constant 3.200000e+01 : f32
    %186 = vector.broadcast %cst_68 : f32 to vector<16x1xf32>
    %187 = arith.divf %185, %186 : vector<16x1xf32>
    %188 = vector.broadcast %180 : vector<16x1xf32> to vector<16x32xf32>
    %189 = arith.subf %174, %188 : vector<16x32xf32>
    %cst_69 = arith.constant 9.99999974E-6 : f32
    %190 = vector.broadcast %cst_69 : f32 to vector<16x1xf32>
    %191 = arith.addf %187, %190 : vector<16x1xf32>
    %192 = math.rsqrt %191 : vector<16x1xf32>
    %193 = vector.broadcast %192 : vector<16x1xf32> to vector<16x32xf32>
    %194 = arith.mulf %189, %193 : vector<16x32xf32>
    %195 = vector.broadcast %175 : vector<1x32xf32> to vector<16x32xf32>
    %196 = arith.mulf %194, %195 : vector<16x32xf32>
    %197 = vector.broadcast %176 : vector<1x32xf32> to vector<16x32xf32>
    %198 = arith.addf %196, %197 : vector<16x32xf32>
    %c1_70 = arith.constant 1 : index
    %c0_71 = arith.constant 0 : index
    %c0_72 = arith.constant 0 : index
    %199 = vector.load %arg7[%c1_70, %c0_71, %c0_72] : memref<2x32x64xf32, #tpu.memory_space<vmem>>, vector<1x32x64xf32>
    %200 = vector.shape_cast %199 : vector<1x32x64xf32> to vector<32x64xf32>
    %cst_73 = arith.constant dense<0.000000e+00> : vector<16x64xf32>
    %201 = tpu.matmul %198, %200, %cst_73 {dimension_numbers = #tpu.dot_dimension_numbers<[1], [0], [0], [1], [0, 0, 1, 1], [], []>} : vector<16x32xf32>, vector<32x64xf32>, vector<16x64xf32> -> vector<16x64xf32>
    %c1_74 = arith.constant 1 : index
    %c0_75 = arith.constant 0 : index
    %c0_76 = arith.constant 0 : index
    %202 = vector.load %arg8[%c1_74, %c0_75, %c0_76] : memref<2x1x64xf32, #tpu.memory_space<vmem>>, vector<1x1x64xf32>
    %203 = vector.shape_cast %202 : vector<1x1x64xf32> to vector<1x64xf32>
    %204 = vector.broadcast %203 : vector<1x64xf32> to vector<16x64xf32>
    %205 = arith.addf %201, %204 : vector<16x64xf32>
    %cst_77 = arith.constant 0.000000e+00 : f32
    %206 = vector.broadcast %cst_77 : f32 to vector<16x64xf32>
    %207 = arith.maximumf %205, %206 : vector<16x64xf32>
    %c1_78 = arith.constant 1 : index
    %c0_79 = arith.constant 0 : index
    %c0_80 = arith.constant 0 : index
    %208 = vector.load %arg9[%c1_78, %c0_79, %c0_80] : memref<2x64x32xf32, #tpu.memory_space<vmem>>, vector<1x64x32xf32>
    %209 = vector.shape_cast %208 : vector<1x64x32xf32> to vector<64x32xf32>
    %cst_81 = arith.constant dense<0.000000e+00> : vector<16x32xf32>
    %210 = tpu.matmul %207, %209, %cst_81 {dimension_numbers = #tpu.dot_dimension_numbers<[1], [0], [0], [1], [0, 0, 1, 1], [], []>} : vector<16x64xf32>, vector<64x32xf32>, vector<16x32xf32> -> vector<16x32xf32>
    %211 = vector.extract_strided_slice %127 {offsets = [3, 0], sizes = [1, 32], strides = [1, 1]} : vector<6x32xf32> to vector<1x32xf32>
    %212 = vector.broadcast %211 : vector<1x32xf32> to vector<16x32xf32>
    %213 = arith.addf %210, %212 : vector<16x32xf32>
    %214 = arith.addf %198, %213 : vector<16x32xf32>
    %215 = vector.extract_strided_slice %127 {offsets = [4, 0], sizes = [1, 32], strides = [1, 1]} : vector<6x32xf32> to vector<1x32xf32>
    %216 = vector.extract_strided_slice %127 {offsets = [5, 0], sizes = [1, 32], strides = [1, 1]} : vector<6x32xf32> to vector<1x32xf32>
    %cst_82 = arith.constant dense<0.000000e+00> : vector<16xf32>
    %217 = vector.multi_reduction <add>, %214, %cst_82 [1] : vector<16x32xf32> to vector<16xf32>
    %218 = vector.shape_cast %217 : vector<16xf32> to vector<16x1xf32>
    %cst_83 = arith.constant 3.200000e+01 : f32
    %219 = vector.broadcast %cst_83 : f32 to vector<16x1xf32>
    %220 = arith.divf %218, %219 : vector<16x1xf32>
    %221 = vector.broadcast %220 : vector<16x1xf32> to vector<16x32xf32>
    %222 = arith.subf %214, %221 : vector<16x32xf32>
    %223 = arith.mulf %222, %222 : vector<16x32xf32>
    %cst_84 = arith.constant dense<0.000000e+00> : vector<16xf32>
    %224 = vector.multi_reduction <add>, %223, %cst_84 [1] : vector<16x32xf32> to vector<16xf32>
    %225 = vector.shape_cast %224 : vector<16xf32> to vector<16x1xf32>
    %cst_85 = arith.constant 3.200000e+01 : f32
    %226 = vector.broadcast %cst_85 : f32 to vector<16x1xf32>
    %227 = arith.divf %225, %226 : vector<16x1xf32>
    %228 = vector.broadcast %220 : vector<16x1xf32> to vector<16x32xf32>
    %229 = arith.subf %214, %228 : vector<16x32xf32>
    %cst_86 = arith.constant 9.99999974E-6 : f32
    %230 = vector.broadcast %cst_86 : f32 to vector<16x1xf32>
    %231 = arith.addf %227, %230 : vector<16x1xf32>
    %232 = math.rsqrt %231 : vector<16x1xf32>
    %233 = vector.broadcast %232 : vector<16x1xf32> to vector<16x32xf32>
    %234 = arith.mulf %229, %233 : vector<16x32xf32>
    %235 = vector.broadcast %215 : vector<1x32xf32> to vector<16x32xf32>
    %236 = arith.mulf %234, %235 : vector<16x32xf32>
    %237 = vector.broadcast %216 : vector<1x32xf32> to vector<16x32xf32>
    %238 = arith.addf %236, %237 : vector<16x32xf32>
    %cst_87 = arith.constant 0.000000e+00 : f32
    %239 = vector.broadcast %cst_87 : f32 to vector<16x32xf32>
    %240 = arith.maximumf %238, %239 : vector<16x32xf32>
    %241 = vector.shape_cast %240 : vector<16x32xf32> to vector<2x8x32xf32>
    %242 = vector.extract_strided_slice %241 {offsets = [0, 0, 0], sizes = [2, 1, 32], strides = [1, 1, 1]} : vector<2x8x32xf32> to vector<2x1x32xf32>
    %243 = vector.shape_cast %242 : vector<2x1x32xf32> to vector<2x32xf32>
    %244 = vector.extract_strided_slice %241 {offsets = [0, 1, 0], sizes = [2, 1, 32], strides = [1, 1, 1]} : vector<2x8x32xf32> to vector<2x1x32xf32>
    %245 = vector.shape_cast %244 : vector<2x1x32xf32> to vector<2x32xf32>
    %246 = vector.extract_strided_slice %241 {offsets = [0, 2, 0], sizes = [2, 1, 32], strides = [1, 1, 1]} : vector<2x8x32xf32> to vector<2x1x32xf32>
    %247 = vector.shape_cast %246 : vector<2x1x32xf32> to vector<2x32xf32>
    %248 = vector.extract_strided_slice %241 {offsets = [0, 3, 0], sizes = [2, 1, 32], strides = [1, 1, 1]} : vector<2x8x32xf32> to vector<2x1x32xf32>
    %249 = vector.shape_cast %248 : vector<2x1x32xf32> to vector<2x32xf32>
    %250 = vector.extract_strided_slice %241 {offsets = [0, 4, 0], sizes = [2, 1, 32], strides = [1, 1, 1]} : vector<2x8x32xf32> to vector<2x1x32xf32>
    %251 = vector.shape_cast %250 : vector<2x1x32xf32> to vector<2x32xf32>
    %252 = vector.extract_strided_slice %241 {offsets = [0, 5, 0], sizes = [2, 1, 32], strides = [1, 1, 1]} : vector<2x8x32xf32> to vector<2x1x32xf32>
    %253 = vector.shape_cast %252 : vector<2x1x32xf32> to vector<2x32xf32>
    %254 = vector.extract_strided_slice %241 {offsets = [0, 6, 0], sizes = [2, 1, 32], strides = [1, 1, 1]} : vector<2x8x32xf32> to vector<2x1x32xf32>
    %255 = vector.shape_cast %254 : vector<2x1x32xf32> to vector<2x32xf32>
    %256 = vector.extract_strided_slice %241 {offsets = [0, 7, 0], sizes = [2, 1, 32], strides = [1, 1, 1]} : vector<2x8x32xf32> to vector<2x1x32xf32>
    %257 = vector.shape_cast %256 : vector<2x1x32xf32> to vector<2x32xf32>
    %258 = tpu.concatenate %243, %245, %247, %249, %251, %253, %255, %257 in 1 : vector<2x32xf32>, vector<2x32xf32>, vector<2x32xf32>, vector<2x32xf32>, vector<2x32xf32>, vector<2x32xf32>, vector<2x32xf32>, vector<2x32xf32> -> vector<2x256xf32>
    %cst_88 = arith.constant 0.000000e+00 : f32
    %259 = vector.broadcast %cst_88 : f32 to vector<6x256xf32>
    %260 = tpu.concatenate %258, %259 in 0 : vector<2x256xf32>, vector<6x256xf32> -> vector<8x256xf32>
    %c0_89 = arith.constant 0 : index
    %c0_90 = arith.constant 0 : index
    %261 = vector.load %arg11[%c0_89, %c0_90] : memref<256x8xf32, #tpu.memory_space<vmem>>, vector<256x8xf32>
    %cst_91 = arith.constant dense<0.000000e+00> : vector<8x8xf32>
    %262 = tpu.matmul %260, %261, %cst_91 {dimension_numbers = #tpu.dot_dimension_numbers<[1], [0], [0], [1], [0, 0, 1, 1], [], []>} : vector<8x256xf32>, vector<256x8xf32>, vector<8x8xf32> -> vector<8x8xf32>
    %c0_92 = arith.constant 0 : index
    %c0_93 = arith.constant 0 : index
    %263 = vector.load %arg12[%c0_92, %c0_93] : memref<1x8xf32, #tpu.memory_space<vmem>>, vector<1x8xf32>
    %264 = vector.broadcast %263 : vector<1x8xf32> to vector<8x8xf32>
    %265 = arith.addf %262, %264 : vector<8x8xf32>
    %c0_94 = arith.constant 0 : index
    %c0_95 = arith.constant 0 : index
    %266 = vector.load %arg13[%c0_94, %c0_95] : memref<8x8xf32, #tpu.memory_space<vmem>>, vector<8x8xf32>
    tpu.vector_store %arg13[%c0_94, %c0_95], %265 {strides = array<i32>} : memref<8x8xf32, #tpu.memory_space<vmem>>, vector<8x8xf32>,
    return
  }
}

</mosaic_0001>

<bundles_post_ra>
// kernel: tpu_custom_call.1
= control target key start
LH: loop header
LB: loop body
LE: loop exit
PB: predicated region body
PF: predicated region fallthrough
CT: control target
= control target key end

     0   :  { %vm62_vm0 = vcmask 1043456   ;;  %vm55_vm1 = vcmask 31744   ;;  %s5514_s0 = inlined_call_operand.vmem [shape: f32[2,8,4], index: 0, kind: input, shape index: {}]   ;;  %s5515_s1 = inlined_call_operand.vmem [shape: f32[4,32], index: 1, kind: input, shape index: {}]   ;;  %s5516_s2 = inlined_call_operand.vmem [shape: f32[1,32], index: 2, kind: input, shape index: {}]   ;;  %s5517_s3 = inlined_call_operand.vmem [shape: f32[8,32], index: 3, kind: input, shape index: {}]   ;;  %s5518_s4 = inlined_call_operand.vmem [shape: f32[2,32,96], index: 4, kind: input, shape index: {}]   ;;  %s5519_s5 = inlined_call_operand.vmem [shape: f32[2,1,96], index: 5, kind: input, shape index: {}]   ;;  %s5520_s6 = inlined_call_operand.vmem [shape: f32[2,32,32], index: 6, kind: input, shape index: {}]   ;;  %s5521_s7 = inlined_call_operand.vmem [shape: f32[2,32,64], index: 7, kind: input, shape index: {}]   ;;  %s5522_s8 = inlined_call_operand.vmem [shape: f32[2,1,64], index: 8, kind: input, shape index: {}]   ;;  %s5523_s9 = inlined_call_operand.vmem [shape: f32[2,64,32], index: 9, kind: input, shape index: {}]   ;;  %s5524_s10 = inlined_call_operand.vmem [shape: f32[2,6,32], index: 10, kind: input, shape index: {}]   ;;  %s5525_s11 = inlined_call_operand.vmem [shape: f32[256,8], index: 11, kind: input, shape index: {}]   ;;  %s5526_s12 = inlined_call_operand.vmem [shape: f32[1,8], index: 12, kind: input, shape index: {}]   ;;  %s5527_s13 = inlined_call_operand.hbm [shape: f32[8,8], index: 13, kind: output, shape index: {}]  }
   0x1   :  { %v47_v0 = vld [vmem:[%s5515_s1] sm:$0xf]  ;;  %v46_v2 = vld [vmem:[%s5514_s0 + $0x8] sm:$0xff] }
   0x2   :  { %v45_v1 = vld [vmem:[%s5514_s0] sm:$0xff]  ;;  %4188 = vmatprep.subr.msk.mxu0 %vm62_vm0, %v47_v0  ;;  %v146_v4 = vld [vmem:[%s5518_s4 + $0x8] sm:$0xff] }
   0x3   :  { %4190 = vmatprep.mubr.msk.f32.mxu0 %vm55_vm1, %v45_v1  ;;  %v145_v3 = vld [vmem:[%s5518_s4] sm:$0xff] }
   0x4   :  { %18 = vsyncpa [#allocation3], 0  ;;  %4189 = vmatpush3.msk.msra.mxu0 %vm62_vm0, %v47_v0  ;;  %v4457_v5 = vpack.c.bf16 %v146_v4, %v145_v3  ;;  %v147_v6 = vld [vmem:[%s5518_s4 + $0x10] sm:$0xff]  ;;  %v148_v7 = vld [vmem:[%s5518_s4 + $0x18] sm:$0xff]  ;;  %vm156_vm2 = vcmask 261120   ;;  %v4685_v19 = vmov 0.0  }
   0x5   :  { %4191 = vmatmul.mubr.msk.f32.vlgmr.msra.gmra.mrb[0].mxu0 %vm55_vm1, %v46_v2  ;;  %v4461_v8 = vpack.c.bf16 %v148_v7, %v147_v6  ;;  %v3932_v9 = vld [vmem:[%s5516_s2] ss:$0 sm:$0xff]  ;;  %4204 = vmatprep.subr.mxu0 %v4685_v19  ;;  %s4687_s25 = smov 120   ;;  %vm4688_vm3 = vmmov 0   ;;  %s4689_s26 = smov 104   ;;  %vm254_vm4 = vcmask 64512  }
   0x6   :  { %4458 = vmatprep.subr.bf16.mxu1 %v4457_v5  ;;  %v141_v12 = vld [vmem:[%s5517_s3] sm:$0xff]  ;;  %s4686_s3 = smov 112   ;;  %4206 = vmatprep.mubr.msk.f32.mxu0 %vm4688_vm3, %v4685_v19  ;;  %s4690_s27 = smov 96   ;;  %vm1583_vm5 = vcmask 130048   ;;  %vm1586_vm6 = vcmask 195584   ;;  %vm1825_vm7 = vcmask 523264  }
   0x7   :  { %4460 = vmatpush3.bf16.msra.mxu1 %v4457_v5  ;;  %v3936_v17 = vld [vmem:[%s5519_s5] ss:$0 sm:$0xff]  ;;  %s4691_s28 = smov 64   ;;  %s4692_s0 = smov 8   ;;  %vm3756_vm8 = vcmask 1041409   ;;  %vm3800_vm9 = vcmask 785408  }
   0x8   :  { %4462 = vmatprep.subr.bf16.mxu1 %v4461_v8  ;;  %s4693_s19 = smov 16   ;;  %s4694_s20 = smov 24   ;;  %vm3805_vm10 = vcmask 1041408  }
   0x9   :  { %s4695_s17 = smov 32  }
   0xb   :  { %4464 = vmatpush3.bf16.msra.mxu1 %v4461_v8 }
   0xc   :  { %4214 = vmatprep.subr.mxu1 %v4685_v19 }
  0xd8   :  { %v4192_v10 = vpop.f32.mrb[0].mxu0 }
  0xd9   :  { %v138_v11 = vadd.f32 %v4192_v10, %v3932_v9  ;;  %v132_v13 = vpop.f32.mrb[1].mxu0 }
  0xda   :  { %v133_v14 = vadd.f32 %v3932_v9, %v132_v13 }
  0xdb   :  { %v4796_v16 = vadd.f32 %v141_v12, %v138_v11 }
  0xdc   :  { %v4794_v15 = vadd.f32 %v141_v12, %v133_v14 }
  0xde   :  { %4201 = vmatprep.mubr.msk.f32.mxu1 %vm156_vm2, %v4794_v15 }
  0xdf   :  { %4202 = vmatmul.mubr.msk.f32.vlgmr.msra.gmra.mrb[0].mxu1 %vm156_vm2, %v4796_v16 }
  0xe0   :  { %4216 = vmatprep.mubr.msk.f32.mxu1 %vm4688_vm3, %v4685_v19 }
 0x1b2   :  { %v4203_v18 = vpop.f32.mrb[0].mxu1 }
 0x1b3   :  { %v229_v20 = vpop.f32.mrb[1].mxu1  ;;  %v4817_v22 = vadd.f32 %v4203_v18, %v3936_v17 }
 0x1b4   :  { %v4807_v21 = vadd.f32 %v3936_v17, %v229_v20 }
 0x1b6   :  { %244 = vrot.lane.b32.xlu1 %v4807_v21, %s4686_s3  ;;  %240 = vrot.lane.b32.xlu0 %v4807_v21, %s4687_s25 }
 0x1ba   :  { %246 = vrot.lane.b32.xlu1 %v4817_v22, %s4686_s3  ;;  %242 = vrot.lane.b32.xlu0 %v4817_v22, %s4687_s25 }
 0x1be   :  { %250 = vrot.lane.b32.xlu1 %v4817_v22, %s4689_s26  ;;  %248 = vrot.lane.b32.xlu0 %v4807_v21, %s4689_s26 }
 0x1c2   :  { %329 = vrot.lane.b32.xlu1 %v4817_v22, %s4690_s27  ;;  %252 = vrot.lane.b32.xlu0 %v4807_v21, %s4690_s27 }
 0x228   :  { %v4831_v23 = vpop.permute.xlu1 %244  ;;  %v4833_v24 = vpop.permute.xlu0 %240 }
 0x229   :  { %405 = vrot.lane.b32.xlu0 %v4833_v24, %s4690_s27 }
 0x22c   :  { %v4837_v25 = vpop.permute.xlu1 %246  ;;  %v4839_v26 = vpop.permute.xlu0 %242 }
 0x22d   :  { %557 = vrot.lane.b32.xlu0 %v4831_v23, %s4690_s27  ;;  %481 = vrot.lane.b32.xlu1 %v4839_v26, %s4690_s27 }
 0x230   :  { %v4845_v27 = vpop.permute.xlu0 %248  ;;  %v4851_v28 = vpop.permute.xlu1 %250 }
 0x231   :  { %633 = vrot.lane.b32.xlu1 %v4837_v25, %s4690_s27  ;;  %709 = vrot.lane.b32.xlu0 %v4845_v27, %s4690_s27 }
 0x234   :  { %v253_v29 = vpop.permute.xlu0 %252  ;;  %v330_v30 = vpop.permute.xlu1 %329 }
 0x235   :  { %785 = vrot.lane.b32.xlu1 %v4851_v28, %s4690_s27  ;;  %4205 = vmatpush3.xpose.msk.msra.mxu0 %vm254_vm4, %v253_v29 }
 0x236   :  { %4209 = vmatprep.subr.mxu0 %v4685_v19 }
 0x238   :  { %4207 = vmatmul.mubr.msk.f32.vlgmr.msra.gmra.mrb[2].mxu0 %vm254_vm4, %v4807_v21 }
 0x239   :  { %4210 = vmatpush3.xpose.msk.msra.mxu0 %vm254_vm4, %v330_v30  ;;  %4211 = vmatprep.mubr.msk.f32.mxu0 %vm4688_vm3, %v4685_v19 }
 0x23a   :  { %4219 = vmatprep.subr.mxu0 %v4685_v19 }
 0x23c   :  { %4212 = vmatmul.mubr.msk.f32.vlgmr.msra.gmra.mrb[4].mxu0 %vm254_vm4, %v4817_v22 }
 0x23d   :  { %4221 = vmatprep.mubr.msk.f32.mxu0 %vm4688_vm3, %v4685_v19 }
 0x29b   :  { %v406_v31 = vpop.permute.xlu0 %405 }
 0x29c   :  { %4215 = vmatpush3.xpose.msk.msra.mxu1 %vm254_vm4, %v406_v31 }
 0x29d   :  { %4224 = vmatprep.subr.mxu1 %v4685_v19 }
 0x29f   :  { %v482_v32 = vpop.permute.xlu1 %481  ;;  %4217 = vmatmul.mubr.msk.f32.vlgmr.msra.gmra.mrb[2].mxu1 %vm254_vm4, %v4833_v24  ;;  %v558_v33 = vpop.permute.xlu0 %557 }
 0x2a0   :  { %4220 = vmatpush3.xpose.msk.msra.mxu0 %vm254_vm4, %v482_v32  ;;  %4225 = vmatpush3.xpose.msk.msra.mxu1 %vm254_vm4, %v558_v33 }
 0x2a1   :  { %4226 = vmatprep.mubr.msk.f32.mxu1 %vm4688_vm3, %v4685_v19  ;;  %4229 = vmatprep.subr.mxu0 %v4685_v19 }
 0x2a2   :  { %4234 = vmatprep.subr.mxu1 %v4685_v19 }
 0x2a3   :  { %v634_v34 = vpop.permute.xlu1 %633  ;;  %4222 = vmatmul.mubr.msk.f32.vlgmr.msra.gmra.mrb[6].mxu0 %vm254_vm4, %v4839_v26  ;;  %4227 = vmatmul.mubr.msk.f32.vlgmr.msra.gmra.mrb[4].mxu1 %vm254_vm4, %v4831_v23  ;;  %v710_v35 = vpop.permute.xlu0 %709 }
 0x2a4   :  { %4230 = vmatpush3.xpose.msk.msra.mxu0 %vm254_vm4, %v634_v34  ;;  %4235 = vmatpush3.xpose.msk.msra.mxu1 %vm254_vm4, %v710_v35 }
 0x2a5   :  { %4231 = vmatprep.mubr.msk.f32.mxu0 %vm4688_vm3, %v4685_v19  ;;  %4236 = vmatprep.mubr.msk.f32.mxu1 %vm4688_vm3, %v4685_v19 }
 0x2a6   :  { %4239 = vmatprep.subr.mxu0 %v4685_v19  ;;  %4244 = vmatprep.subr.mxu1 %v4685_v19 }
 0x2a7   :  { %v786_v36 = vpop.permute.xlu1 %785  ;;  %4232 = vmatmul.mubr.msk.f32.vlgmr.msra.gmra.mrb[8].mxu0 %vm254_vm4, %v4837_v25  ;;  %4237 = vmatmul.mubr.msk.f32.vlgmr.msra.gmra.mrb[6].mxu1 %vm254_vm4, %v4845_v27 }
 0x2a8   :  { %4240 = vmatpush3.xpose.msk.msra.mxu0 %vm254_vm4, %v786_v36  ;;  %4241 = vmatprep.mubr.msk.f32.mxu0 %vm4688_vm3, %v4685_v19 }
 0x2a9   :  { %4249 = vmatprep.subr.mxu0 %v4685_v19  ;;  %4246 = vmatprep.mubr.msk.f32.mxu1 %vm4688_vm3, %v4685_v19 }
 0x2ab   :  { %4242 = vmatmul.mubr.msk.f32.vlgmr.msra.gmra.mrb[10].mxu0 %vm254_vm4, %v4851_v28 }
 0x2ac   :  { %4251 = vmatprep.mubr.msk.f32.mxu0 %vm4688_vm3, %v4685_v19 }
 0x30b   :  { %v325_v37 = vpop.f32.mrb[2].mxu0 }
 0x30c   :  { %v4208_v38 = vpop.f32.mrb[3].mxu0  ;;  %v861_v39 = vsel %vm254_vm4, %v325_v37, -inf }
 0x30d   :  { %862 = vmax.xlane.f32.xlu0 %v861_v39 }
 0x30f   :  { %v401_v40 = vpop.f32.mrb[4].mxu0 }
 0x310   :  { %v4213_v41 = vpop.f32.mrb[5].mxu0  ;;  %v864_v42 = vsel %vm254_vm4, %v401_v40, -inf }
 0x311   :  { %865 = vmax.xlane.f32.xlu1 %v864_v42 }
 0x372   :  { %v477_v43 = vpop.f32.mrb[2].mxu1 }
 0x373   :  { %v4218_v44 = vpop.f32.mrb[3].mxu1  ;;  %v867_v45 = vsel %vm254_vm4, %v477_v43, -inf }
 0x374   :  { %868 = vmax.xlane.f32.xlu0 %v867_v45 }
 0x376   :  { %v553_v46 = vpop.f32.mrb[6].mxu0  ;;  %v629_v47 = vpop.f32.mrb[4].mxu1 }
 0x377   :  { %v4223_v48 = vpop.f32.mrb[7].mxu0  ;;  %v4228_v49 = vpop.f32.mrb[5].mxu1  ;;  %v870_v50 = vsel %vm254_vm4, %v553_v46, -inf  ;;  %v873_v51 = vsel %vm254_vm4, %v629_v47, -inf }
 0x378   :  { %871 = vmax.xlane.f32.xlu0 %v870_v50  ;;  %874 = vmax.xlane.f32.xlu1 %v873_v51 }
 0x37a   :  { %v705_v52 = vpop.f32.mrb[8].mxu0  ;;  %v781_v53 = vpop.f32.mrb[6].mxu1 }
 0x37b   :  { %v4233_v54 = vpop.f32.mrb[9].mxu0  ;;  %v4238_v55 = vpop.f32.mrb[7].mxu1  ;;  %v876_v56 = vsel %vm254_vm4, %v705_v52, -inf  ;;  %v879_v57 = vsel %vm254_vm4, %v781_v53, -inf }
 0x37c   :  { %877 = vmax.xlane.f32.xlu0 %v876_v56  ;;  %880 = vmax.xlane.f32.xlu1 %v879_v57 }
 0x37e   :  { %v857_v58 = vpop.f32.mrb[10].mxu0 }
 0x37f   :  { %v4243_v59 = vpop.f32.mrb[11].mxu0  ;;  %v882_v60 = vsel %vm254_vm4, %v857_v58, -inf }
 0x380   :  { %883 = vmax.xlane.f32.xlu0 %v882_v60 }
 0x38d   :  { %949 = vrot.lane.b32.xlu1 %v4807_v21, %s4691_s28 }
 0x391   :  { %1101 = vrot.lane.b32.xlu1 %v4833_v24, %s4691_s28 }
 0x395   :  { %1177 = vrot.lane.b32.xlu1 %v4839_v26, %s4691_s28 }
 0x396   :  { %1025 = vrot.lane.b32.xlu0 %v4817_v22, %s4691_s28 }
 0x399   :  { %1329 = vrot.lane.b32.xlu1 %v4837_v25, %s4691_s28 }
 0x39a   :  { %1253 = vrot.lane.b32.xlu0 %v4831_v23, %s4691_s28  ;;  %v863_v63 = vpop.xlane.xlu0 %862 }
 0x39b   :  { %v885_v0 = vsub.f32 %v325_v37, %v863_v63 }
 0x39d   :  { %v893_v2 = vmul.f32 1.442695, %v885_v0 }
 0x39e   :  { %v866_v61 = vpop.xlane.xlu1 %865 }
 0x39f   :  { %v886_v62 = vsub.f32 %v401_v40, %v866_v61 }
 0x3a1   :  { %v895_v1 = vmul.f32 1.442695, %v886_v62 }
 0x3a3   :  { %4581 = vpow2.f32 %v895_v1 }
 0x3a4   :  { %4583 = vpow2.f32 %v893_v2 }
 0x3ad   :  { %v4923_v3 = vpop.eup %4581 }
 0x3ae   :  { %v912_v4 = vsel %vm254_vm4, %v4923_v3, 0.0  ;;  %v4927_v5 = vpop.eup %4583 }
 0x3af   :  { %v909_v6 = vsel %vm254_vm4, %v4927_v5, 0.0 }
 0x3b9   :  { %913 = vadd.xlane.f32.xlu0 %v912_v4 }
 0x3bd   :  { %910 = vadd.xlane.f32.xlu1 %v909_v6 }
 0x401   :  { %v869_v7 = vpop.xlane.xlu0 %868 }
 0x402   :  { %v887_v8 = vsub.f32 %v477_v43, %v869_v7 }
 0x404   :  { %v897_v9 = vmul.f32 1.442695, %v887_v8 }
 0x405   :  { %v875_v10 = vpop.xlane.xlu1 %874  ;;  %v872_v11 = vpop.xlane.xlu0 %871 }
 0x406   :  { %4585 = vpow2.f32 %v897_v9  ;;  %v889_v12 = vsub.f32 %v629_v47, %v875_v10  ;;  %v888_v13 = vsub.f32 %v553_v46, %v872_v11 }
 0x408   :  { %v901_v14 = vmul.f32 1.442695, %v889_v12  ;;  %v899_v17 = vmul.f32 1.442695, %v888_v13  ;;  %v1589_v12 = vld [vmem:[%s5520_s6] sm:$0xff]  ;;  %v1590_v13 = vld [vmem:[%s5520_s6 + $0x8] sm:$0xff] }
 0x409   :  { %v881_v18 = vpop.xlane.xlu1 %880  ;;  %v878_v20 = vpop.xlane.xlu0 %877 }
 0x40a   :  { %4587 = vpow2.f32 %v901_v14  ;;  %v891_v21 = vsub.f32 %v781_v53, %v881_v18  ;;  %v890_v22 = vsub.f32 %v705_v52, %v878_v20  ;;  %v4465_v14 = vpack.c.bf16 %v1590_v13, %v1589_v12  ;;  %v1592_v18 = vld [vmem:[%s5520_s6 + $0x18] sm:$0xff] }
 0x40b   :  { %4589 = vpow2.f32 %v899_v17  ;;  %v1591_v17 = vld [vmem:[%s5520_s6 + $0x10] sm:$0xff] }
 0x40c   :  { %v905_v23 = vmul.f32 1.442695, %v891_v21  ;;  %v903_v24 = vmul.f32 1.442695, %v890_v22  ;;  %v4469_v20 = vpack.c.bf16 %v1592_v18, %v1591_v17 }
 0x40d   :  { %v950_v25 = vpop.permute.xlu1 %949  ;;  %v884_v26 = vpop.xlane.xlu0 %883 }
 0x40e   :  { %4591 = vpow2.f32 %v905_v23  ;;  %v892_v29 = vsub.f32 %v857_v58, %v884_v26  ;;  %4245 = vmatpush3.msra.mxu1 %v950_v25 }
 0x40f   :  { %4593 = vpow2.f32 %v903_v24  ;;  %4254 = vmatprep.subr.mxu1 %v4685_v19 }
 0x410   :  { %v4586_v30 = vpop.eup %4585  ;;  %v907_v31 = vmul.f32 1.442695, %v892_v29 }
 0x411   :  { %v1026_v32 = vpop.permute.xlu0 %1025  ;;  %v915_v33 = vsel %vm254_vm4, %v4586_v30, 0.0  ;;  %v1102_v44 = vpop.permute.xlu1 %1101 }
 0x412   :  { %4595 = vpow2.f32 %v907_v31  ;;  %916 = vadd.xlane.f32.xlu1 %v915_v33  ;;  %4250 = vmatpush3.msra.mxu0 %v1026_v32 }
 0x413   :  { %4259 = vmatprep.subr.mxu0 %v4685_v19 }
 0x414   :  { %v4588_v34 = vpop.eup %4587 }
 0x415   :  { %v4590_v35 = vpop.eup %4589  ;;  %v921_v36 = vsel %vm254_vm4, %v4588_v34, 0.0  ;;  %v1178_v45 = vpop.permute.xlu1 %1177 }
 0x416   :  { %922 = vadd.xlane.f32.xlu1 %v921_v36  ;;  %v918_v37 = vsel %vm254_vm4, %v4590_v35, 0.0  ;;  %v1254_v46 = vpop.permute.xlu0 %1253 }
 0x417   :  { %919 = vadd.xlane.f32.xlu0 %v918_v37 }
 0x418   :  { %v4592_v38 = vpop.eup %4591 }
 0x419   :  { %v4594_v39 = vpop.eup %4593  ;;  %v927_v40 = vsel %vm254_vm4, %v4592_v38, 0.0  ;;  %v1330_v47 = vpop.permute.xlu1 %1329 }
 0x41a   :  { %928 = vadd.xlane.f32.xlu1 %v927_v40  ;;  %v924_v41 = vsel %vm254_vm4, %v4594_v39, 0.0 }
 0x41b   :  { %925 = vadd.xlane.f32.xlu0 %v924_v41 }
 0x41c   :  { %v4938_v42 = vpop.eup %4595 }
 0x41d   :  { %v930_v43 = vsel %vm254_vm4, %v4938_v42, 0.0 }
 0x41f   :  { %931 = vadd.xlane.f32.xlu0 %v930_v43 }
 0x42b   :  { %1481 = vrot.lane.b32.xlu1 %v4851_v28, %s4691_s28 }
 0x435   :  { %1405 = vrot.lane.b32.xlu0 %v4845_v27, %s4691_s28 }
 0x446   :  { %v914_v48 = vpop.xlane.xlu0 %913 }
 0x447   :  { %4597 = vrcp.f32 %v914_v48 }
 0x44a   :  { %v911_v49 = vpop.xlane.xlu1 %910 }
 0x44b   :  { %4599 = vrcp.f32 %v911_v49 }
 0x451   :  { %v4598_v50 = vpop.eup %4597 }
 0x452   :  { %v936_v51 = vmul.f32 %v4598_v50, %v4923_v3  ;;  %v5005_v50 = vld [vmem:[%s5524_s10] sm:$0x3f] }
 0x454   :  { %4252 = vmatmul.mubr.msk.f32.vlgmr.msra.gmra.mrb[12].mxu0 %vm254_vm4, %v936_v51 }
 0x455   :  { %v4600_v52 = vpop.eup %4599  ;;  %4260 = vmatpush3.msra.mxu0 %v1178_v45  ;;  %4261 = vmatprep.mubr.msk.f32.mxu0 %vm4688_vm3, %v4685_v19 }
 0x456   :  { %v934_v27 = vmul.f32 %v4600_v52, %v4927_v5  ;;  %4269 = vmatprep.subr.mxu0 %v4685_v19 }
 0x458   :  { %4247 = vmatmul.mubr.msk.f32.vlgmr.msra.gmra.mrb[8].mxu1 %vm254_vm4, %v934_v27 }
 0x459   :  { %4255 = vmatpush3.msra.mxu1 %v1102_v44  ;;  %4256 = vmatprep.mubr.msk.f32.mxu1 %vm4688_vm3, %v4685_v19 }
 0x45a   :  { %4264 = vmatprep.subr.mxu1 %v4685_v19 }
 0x49f   :  { %v917_v28 = vpop.xlane.xlu1 %916 }
 0x4a0   :  { %4601 = vrcp.f32 %v917_v28 }
 0x4a3   :  { %v923_v53 = vpop.xlane.xlu1 %922 }
 0x4a4   :  { %4603 = vrcp.f32 %v923_v53  ;;  %v920_v54 = vpop.xlane.xlu0 %919 }
 0x4a5   :  { %4605 = vrcp.f32 %v920_v54 }
 0x4a7   :  { %v929_v55 = vpop.xlane.xlu1 %928 }
 0x4a8   :  { %4607 = vrcp.f32 %v929_v55  ;;  %v926_v56 = vpop.xlane.xlu0 %925 }
 0x4a9   :  { %4609 = vrcp.f32 %v926_v56 }
 0x4aa   :  { %v4602_v57 = vpop.eup %4601 }
 0x4ab   :  { %v938_v58 = vmul.f32 %v4602_v57, %v4586_v30  ;;  %v1482_v5 = vpop.permute.xlu1 %1481 }
 0x4ac   :  { %v932_v59 = vpop.xlane.xlu0 %931 }
 0x4ad   :  { %4611 = vrcp.f32 %v932_v59  ;;  %4257 = vmatmul.mubr.msk.f32.vlgmr.msra.gmra.mrb[10].mxu1 %vm254_vm4, %v938_v58 }
 0x4ae   :  { %v4604_v60 = vpop.eup %4603  ;;  %4265 = vmatpush3.msra.mxu1 %v1254_v46  ;;  %4266 = vmatprep.mubr.msk.f32.mxu1 %vm4688_vm3, %v4685_v19 }
 0x4af   :  { %v4606_v61 = vpop.eup %4605  ;;  %v942_v62 = vmul.f32 %v4604_v60, %v4588_v34  ;;  %4274 = vmatprep.subr.mxu1 %v4685_v19 }
 0x4b0   :  { %v940_v63 = vmul.f32 %v4606_v61, %v4590_v35  ;;  %v1406_v0 = vpop.permute.xlu0 %1405 }
 0x4b1   :  { %4267 = vmatmul.mubr.msk.f32.vlgmr.msra.gmra.mrb[12].mxu1 %vm254_vm4, %v942_v62 }
 0x4b2   :  { %v4608_v1 = vpop.eup %4607  ;;  %4262 = vmatmul.mubr.msk.f32.vlgmr.msra.gmra.mrb[14].mxu0 %vm254_vm4, %v940_v63  ;;  %4275 = vmatpush3.msra.mxu1 %v1406_v0 }
 0x4b3   :  { %v4610_v2 = vpop.eup %4609  ;;  %v946_v3 = vmul.f32 %v4608_v1, %v4592_v38  ;;  %4270 = vmatpush3.msra.mxu0 %v1330_v47  ;;  %4271 = vmatprep.mubr.msk.f32.mxu0 %vm4688_vm3, %v4685_v19  ;;  %v1593_v47 = vlaneseq }
 0x4b4   :  { %v944_v4 = vmul.f32 %v4610_v2, %v4594_v39  ;;  %4276 = vmatprep.mubr.msk.f32.mxu1 %vm4688_vm3, %v4685_v19  ;;  %4279 = vmatprep.subr.mxu0 %v4685_v19 }
 0x4b5   :  { %4277 = vmatmul.mubr.msk.f32.vlgmr.msra.gmra.mrb[14].mxu1 %vm254_vm4, %v946_v3  ;;  %4466 = vmatprep.subr.bf16.mxu1 %v4465_v14  ;;  %v4999_v48 = vshrl.u32 %v1593_v47, 7  ;;  %v1720_v3 = vld [vmem:[%s5521_s7 + $0x8] sm:$0xff] }
 0x4b6   :  { %4272 = vmatmul.mubr.msk.f32.vlgmr.msra.gmra.mrb[16].mxu0 %vm254_vm4, %v944_v4  ;;  %4468 = vmatpush3.bf16.msra.mxu1 %v4465_v14 }
 0x4b7   :  { %v4612_v6 = vpop.eup %4611  ;;  %4280 = vmatpush3.msra.mxu0 %v1482_v5  ;;  %4281 = vmatprep.mubr.msk.f32.mxu0 %vm4688_vm3, %v4685_v19  ;;  %v1595_v49 = vsub.s32 0, %v4999_v48  ;;  %v1721_v5 = vld [vmem:[%s5521_s7 + $0x10] sm:$0xff] }
 0x4b8   :  { %v948_v7 = vmul.f32 %v4612_v6, %v4938_v42  ;;  %4470 = vmatprep.subr.bf16.mxu1 %v4469_v20  ;;  %v1722_v6 = vld [vmem:[%s5521_s7 + $0x18] sm:$0xff] }
 0x4b9   :  { %v1596_v51 = vrot.slane %v5005_v50, %v1595_v49 }
 0x4ba   :  { %4282 = vmatmul.mubr.msk.f32.vlgmr.msra.gmra.mrb[18].mxu0 %vm254_vm4, %v948_v7  ;;  %4472 = vmatpush3.bf16.msra.mxu1 %v4469_v20  ;;  %v4477_v7 = vpack.c.bf16 %v1722_v6, %v1721_v5  ;;  %v1709_v20 = vsub.s32 1, %v4999_v48  ;;  %v3971_v5 = vld [vmem:[%s5518_s4 + $0x20] sm:$0xff]  ;;  %v3972_v6 = vld [vmem:[%s5518_s4 + $0x28] sm:$0xff] }
 0x527   :  { %v1097_v8 = vpop.f32.mrb[12].mxu0 }
 0x528   :  { %v4253_v9 = vpop.f32.mrb[13].mxu0 }
 0x529   :  { %v1814_v9 = vld [vmem:[%s5523_s9 + $0x8] sm:$0xff] }
 0x52b   :  { %v1021_v10 = vpop.f32.mrb[8].mxu1 }
 0x52c   :  { %v4248_v11 = vpop.f32.mrb[9].mxu1 }
 0x580   :  { %v1173_v21 = vpop.f32.mrb[10].mxu1 }
 0x581   :  { %v4258_v22 = vpop.f32.mrb[11].mxu1  ;;  %1559 = vrot.lane.b32.xlu0 %v1173_v21, %s4692_s0  ;;  %v1715_v21 = vsub.s32 2, %v4999_v48 }
 0x582   :  { %v1710_v22 = vrot.slane %v5005_v50, %v1709_v20 }
 0x584   :  { %v1325_v23 = vpop.f32.mrb[12].mxu1 }
 0x585   :  { %v1249_v24 = vpop.f32.mrb[14].mxu0  ;;  %1567 = vrot.lane.b32.xlu0 %v1325_v23, %s4693_s19  ;;  %v4268_v25 = vpop.f32.mrb[13].mxu1 }
 0x586   :  { %1561 = vrot.lane.b32.xlu1 %v1249_v24, %s4692_s0  ;;  %v4263_v26 = vpop.f32.mrb[15].mxu0  ;;  %v1716_v25 = vrot.slane %v5005_v50, %v1715_v21 }
 0x588   :  { %v1477_v29 = vpop.f32.mrb[14].mxu1 }
 0x589   :  { %v1401_v30 = vpop.f32.mrb[16].mxu0  ;;  %1575 = vrot.lane.b32.xlu0 %v1477_v29, %s4694_s20  ;;  %v4278_v31 = vpop.f32.mrb[15].mxu1 }
 0x58a   :  { %1569 = vrot.lane.b32.xlu1 %v1401_v30, %s4693_s19  ;;  %v4273_v32 = vpop.f32.mrb[17].mxu0 }
 0x58b   :  { %v1815_v32 = vld [vmem:[%s5523_s9 + $0x10] sm:$0xff] }
 0x58d   :  { %v1553_v33 = vpop.f32.mrb[18].mxu0 }
 0x58e   :  { %1577 = vrot.lane.b32.xlu1 %v1553_v33, %s4694_s20  ;;  %v4283_v34 = vpop.f32.mrb[19].mxu0  ;;  %v1816_v33 = vld [vmem:[%s5523_s9 + $0x18] sm:$0xff] }
 0x5f3   :  { %v1560_v35 = vpop.permute.xlu0 %1559 }
 0x5f4   :  { %v1581_v38 = vsel %vm254_vm4, %v1021_v10, %v1560_v35 }
 0x5f7   :  { %v1568_v36 = vpop.permute.xlu0 %1567 }
 0x5f8   :  { %v1562_v37 = vpop.permute.xlu1 %1561  ;;  %v1584_v39 = vsel %vm1583_vm5, %v1581_v38, %v1568_v36  ;;  %v4485_v36 = vpack.c.bf16 %v1816_v33, %v1815_v32  ;;  %v1818_v38 = vld [vmem:[%s5523_s9 + $0x28] sm:$0xff] }
 0x5f9   :  { %v1582_v43 = vsel %vm254_vm4, %v1097_v8, %v1562_v37  ;;  %v1813_v8 = vld [vmem:[%s5523_s9] sm:$0xff] }
 0x5fa   :  { %v4481_v10 = vpack.c.bf16 %v1814_v9, %v1813_v8  ;;  %v1817_v37 = vld [vmem:[%s5523_s9 + $0x20] sm:$0xff]  ;;  %v3973_v8 = vld [vmem:[%s5518_s4 + $0x30] sm:$0xff]  ;;  %v3974_v9 = vld [vmem:[%s5518_s4 + $0x38] sm:$0xff] }
 0x5fb   :  { %v1576_v40 = vpop.permute.xlu0 %1575 }
 0x5fc   :  { %v1570_v41 = vpop.permute.xlu1 %1569  ;;  %v1587_v42 = vsel %vm1586_vm6, %v1584_v39, %v1576_v40  ;;  %v4489_v39 = vpack.c.bf16 %v1818_v38, %v1817_v37  ;;  %v1819_v40 = vld [vmem:[%s5523_s9 + $0x30] sm:$0xff] }
 0x5fd   :  { %4292 = vmatprep.mubr.msk.f32.mxu1 %vm156_vm2, %v1587_v42  ;;  %v1585_v44 = vsel %vm1583_vm5, %v1582_v43, %v1570_v41  ;;  %v1820_v41 = vld [vmem:[%s5523_s9 + $0x38] sm:$0xff]  ;;  %v3965_v43 = vld [vmem:[%s5522_s8] ss:$0 sm:$0xff] }
 0x5fe   :  { %v4493_v42 = vpack.c.bf16 %v1820_v41, %v1819_v40 }
 0x600   :  { %v1578_v45 = vpop.permute.xlu1 %1577 }
 0x601   :  { %v1588_v46 = vsel %vm1586_vm6, %v1585_v44, %v1578_v45 }
 0x602   :  { %4293 = vmatmul.mubr.msk.f32.vlgmr.msra.gmra.mrb[16].mxu1 %vm156_vm2, %v1588_v46 }
 0x6d5   :  { %v4294_v52 = vpop.f32.mrb[16].mxu1 }
 0x6d6   :  { %v1675_v27 = vadd.f32 %v4294_v52, %v1596_v51  ;;  %v1669_v28 = vpop.f32.mrb[17].mxu1 }
 0x6d7   :  { %v1670_v53 = vadd.f32 %v1669_v28, %v1596_v51 }
 0x6d8   :  { %v1679_v54 = vadd.f32 %v1675_v27, %v4796_v16  ;;  %v1823_v27 = vsub.s32 3, %v4999_v48 }
 0x6d9   :  { %v1678_v55 = vadd.f32 %v1670_v53, %v4794_v15  ;;  %v1719_v15 = vld [vmem:[%s5521_s7] sm:$0xff] }
 0x6da   :  { %v1683_v56 = vsel %vm156_vm2, %v1679_v54, 0.0  ;;  %v4473_v4 = vpack.c.bf16 %v1720_v3, %v1719_v15  ;;  %v1824_v28 = vrot.slane %v5005_v50, %v1823_v27 }
 0x6db   :  { %1684 = vadd.xlane.f32.xlu1 %v1683_v56  ;;  %v1680_v57 = vsel %vm156_vm2, %v1678_v55, 0.0 }
 0x6dc   :  { %1681 = vadd.xlane.f32.xlu0 %v1680_v57  ;;  %4474 = vmatprep.subr.bf16.mxu1 %v4473_v4 }
 0x6dd   :  { %4476 = vmatpush3.bf16.msra.mxu1 %v4473_v4 }
 0x6de   :  { %4478 = vmatprep.subr.bf16.mxu1 %v4477_v7 }
 0x6e1   :  { %4480 = vmatpush3.bf16.msra.mxu1 %v4477_v7  ;;  %v4497_v7 = vpack.c.bf16 %v3972_v6, %v3971_v5 }
 0x6e2   :  { %4482 = vmatprep.subr.bf16.mxu1 %v4481_v10 }
 0x6e3   :  { %4498 = vmatprep.subr.bf16.mxu0 %v4497_v7 }
 0x6e4   :  { %4500 = vmatpush3.bf16.msra.mxu0 %v4497_v7 }
 0x768   :  { %v1685_v58 = vpop.xlane.xlu1 %1684 }
 0x769   :  { %v1688_v59 = vmul.f32 0.03125, %v1685_v58  ;;  %v1682_v60 = vpop.xlane.xlu0 %1681 }
 0x76a   :  { %v1687_v61 = vmul.f32 0.03125, %v1682_v60 }
 0x76b   :  { %v1690_v62 = vsub.f32 %v1679_v54, %v1688_v59 }
 0x76c   :  { %v1689_v63 = vsub.f32 %v1678_v55, %v1687_v61 }
 0x76d   :  { %v1692_v2 = vmul.f32 %v1690_v62, %v1690_v62 }
 0x76e   :  { %v1691_v0 = vmul.f32 %v1689_v63, %v1689_v63 }
 0x76f   :  { %v1696_v16 = vsel %vm156_vm2, %v1692_v2, 0.0 }
 0x770   :  { %v1693_v1 = vsel %vm156_vm2, %v1691_v0, 0.0 }
 0x771   :  { %1694 = vadd.xlane.f32.xlu0 %v1693_v1 }
 0x775   :  { %1697 = vadd.xlane.f32.xlu0 %v1696_v16 }
 0x7fe   :  { %v1695_v11 = vpop.xlane.xlu0 %1694 }
 0x7ff   :  { %v1699_v12 = vmul.f32 0.03125, %v1695_v11 }
 0x801   :  { %v1701_v13 = vadd.f32 1e-05, %v1699_v12 }
 0x802   :  { %v1698_v14 = vpop.xlane.xlu0 %1697 }
 0x803   :  { %4613 = vrsqrt.f32 %v1701_v13  ;;  %v1700_v17 = vmul.f32 0.03125, %v1698_v14 }
 0x805   :  { %v1702_v18 = vadd.f32 1e-05, %v1700_v17 }
 0x807   :  { %4615 = vrsqrt.f32 %v1702_v18 }
 0x80d   :  { %v4614_v23 = vpop.eup %4613 }
 0x80e   :  { %v1705_v24 = vmul.f32 %v4614_v23, %v1689_v63  ;;  %v1943_v23 = vsub.s32 5, %v4999_v48 }
 0x810   :  { %v1711_v26 = vmul.f32 %v1710_v22, %v1705_v24 }
 0x811   :  { %v4616_v29 = vpop.eup %4615 }
 0x812   :  { %v1706_v30 = vmul.f32 %v4616_v29, %v1690_v62  ;;  %v1717_v31 = vadd.f32 %v1716_v25, %v1711_v26 }
 0x814   :  { %v1712_v34 = vmul.f32 %v1710_v22, %v1706_v30  ;;  %4303 = vmatprep.mubr.msk.f32.mxu1 %vm156_vm2, %v1717_v31  ;;  %v1937_v22 = vsub.s32 4, %v4999_v48  ;;  %v3836_v48 = vld [vmem:[%s5525_s11 + $0xe0] sm:$0xff] }
 0x816   :  { %v1718_v35 = vadd.f32 %v1716_v25, %v1712_v34  ;;  %v1938_v24 = vrot.slane %v5005_v50, %v1937_v22 }
 0x818   :  { %4304 = vmatmul.mubr.msk.f32.vlgmr.msra.gmra.mrb[18].mxu1 %vm156_vm2, %v1718_v35 }
 0x819   :  { %4484 = vmatpush3.bf16.msra.mxu1 %v4481_v10  ;;  %v4501_v10 = vpack.c.bf16 %v3974_v9, %v3973_v8 }
 0x81a   :  { %4486 = vmatprep.subr.bf16.mxu1 %v4485_v36 }
 0x81b   :  { %4502 = vmatprep.subr.bf16.mxu0 %v4501_v10 }
 0x81c   :  { %4504 = vmatpush3.bf16.msra.mxu0 %v4501_v10 }
 0x81d   :  { %4488 = vmatpush3.bf16.msra.mxu1 %v4485_v36  ;;  %4336 = vmatprep.subr.mxu0 %v4685_v19  ;;  %v3976_v36 = vld [vmem:[%s5519_s5 + $0x1] ss:$0 sm:$0xff] }
 0x81e   :  { %4490 = vmatprep.subr.bf16.mxu1 %v4489_v39 }
 0x821   :  { %4492 = vmatpush3.bf16.msra.mxu1 %v4489_v39 }
 0x822   :  { %4494 = vmatprep.subr.bf16.mxu1 %v4493_v42 }
 0x825   :  { %4496 = vmatpush3.bf16.msra.mxu1 %v4493_v42 }
 0x826   :  { %4346 = vmatprep.subr.mxu1 %v4685_v19 }
 0x8eb   :  { %v4305_v44 = vpop.f32.mrb[18].mxu1 }
 0x8ec   :  { %v1808_v45 = vadd.f32 %v4305_v44, %v3965_v43  ;;  %v1802_v46 = vpop.f32.mrb[19].mxu1 }
 0x8ed   :  { %v1803_v47 = vadd.f32 %v3965_v43, %v1802_v46 }
 0x8ee   :  { %v1812_v52 = vmax.f32 %v1808_v45, 0.0 }
 0x8ef   :  { %v1811_v51 = vmax.f32 %v1803_v47, 0.0 }
 0x8f1   :  { %4322 = vmatprep.mubr.msk.f32.mxu1 %vm1825_vm7, %v1811_v51 }
 0x8f2   :  { %4323 = vmatmul.mubr.msk.f32.vlgmr.msra.gmra.mrb[20].mxu1 %vm1825_vm7, %v1812_v52 }
 0x8f3   :  { %4348 = vmatprep.mubr.msk.f32.mxu1 %vm4688_vm3, %v4685_v19 }
 0x9c5   :  { %v4324_v53 = vpop.f32.mrb[20].mxu1 }
 0x9c6   :  { %v1904_v54 = vadd.f32 %v4324_v53, %v1824_v28  ;;  %v1898_v55 = vpop.f32.mrb[21].mxu1 }
 0x9c7   :  { %v1899_v56 = vadd.f32 %v1898_v55, %v1824_v28 }
 0x9c8   :  { %v1908_v57 = vadd.f32 %v1904_v54, %v1718_v35 }
 0x9c9   :  { %v1907_v58 = vadd.f32 %v1899_v56, %v1717_v31  ;;  %v1944_v31 = vrot.slane %v5005_v50, %v1943_v23 }
 0x9ca   :  { %v1912_v59 = vsel %vm156_vm2, %v1908_v57, 0.0 }
 0x9cb   :  { %1913 = vadd.xlane.f32.xlu0 %v1912_v59  ;;  %v1909_v60 = vsel %vm156_vm2, %v1907_v58, 0.0 }
 0x9cc   :  { %1910 = vadd.xlane.f32.xlu1 %v1909_v60 }
 0xa58   :  { %v1914_v61 = vpop.xlane.xlu0 %1913 }
 0xa59   :  { %v1916_v62 = vmul.f32 0.03125, %v1914_v61  ;;  %v1911_v63 = vpop.xlane.xlu1 %1910 }
 0xa5a   :  { %v1915_v0 = vmul.f32 0.03125, %v1911_v63 }
 0xa5b   :  { %v1918_v1 = vsub.f32 %v1908_v57, %v1916_v62 }
 0xa5c   :  { %v1917_v2 = vsub.f32 %v1907_v58, %v1915_v0 }
 0xa5d   :  { %v1920_v16 = vmul.f32 %v1918_v1, %v1918_v1 }
 0xa5e   :  { %v1919_v15 = vmul.f32 %v1917_v2, %v1917_v2 }
 0xa5f   :  { %v1924_v3 = vsel %vm156_vm2, %v1920_v16, 0.0 }
 0xa60   :  { %1925 = vadd.xlane.f32.xlu0 %v1924_v3  ;;  %v1921_v4 = vsel %vm156_vm2, %v1919_v15, 0.0 }
 0xa61   :  { %1922 = vadd.xlane.f32.xlu1 %v1921_v4 }
 0xaed   :  { %v1926_v11 = vpop.xlane.xlu0 %1925 }
 0xaee   :  { %v1928_v12 = vmul.f32 0.03125, %v1926_v11  ;;  %v1923_v13 = vpop.xlane.xlu1 %1922 }
 0xaef   :  { %v1927_v14 = vmul.f32 0.03125, %v1923_v13 }
 0xaf0   :  { %v1930_v17 = vadd.f32 1e-05, %v1928_v12 }
 0xaf1   :  { %v1929_v18 = vadd.f32 1e-05, %v1927_v14 }
 0xaf2   :  { %4617 = vrsqrt.f32 %v1930_v17 }
 0xaf3   :  { %4619 = vrsqrt.f32 %v1929_v18 }
 0xafc   :  { %v4618_v25 = vpop.eup %4617 }
 0xafd   :  { %v4620_v26 = vpop.eup %4619  ;;  %v1934_v29 = vmul.f32 %v4618_v25, %v1918_v1 }
 0xafe   :  { %v1933_v30 = vmul.f32 %v4620_v26, %v1917_v2 }
 0xaff   :  { %v1940_v32 = vmul.f32 %v1938_v24, %v1934_v29 }
 0xb00   :  { %v1939_v33 = vmul.f32 %v1938_v24, %v1933_v30 }
 0xb01   :  { %v5101_v35 = vadd.f32 %v1944_v31, %v1940_v32 }
 0xb02   :  { %v5099_v34 = vadd.f32 %v1944_v31, %v1939_v33 }
 0xb04   :  { %4333 = vmatprep.mubr.msk.f32.mxu0 %vm156_vm2, %v5099_v34 }
 0xb05   :  { %4334 = vmatmul.mubr.msk.f32.vlgmr.msra.gmra.mrb[20].mxu0 %vm156_vm2, %v5101_v35 }
 0xb06   :  { %4338 = vmatprep.mubr.msk.f32.mxu0 %vm4688_vm3, %v4685_v19 }
 0xbd8   :  { %v4335_v50 = vpop.f32.mrb[20].mxu0 }
 0xbd9   :  { %v5112_v37 = vadd.f32 %v4335_v50, %v3976_v36  ;;  %v2034_v38 = vpop.f32.mrb[21].mxu0 }
 0xbda   :  { %v5114_v39 = vadd.f32 %v3976_v36, %v2034_v38 }
 0xbdb   :  { %2047 = vrot.lane.b32.xlu0 %v5112_v37, %s4687_s25 }
 0xbdc   :  { %2045 = vrot.lane.b32.xlu1 %v5114_v39, %s4687_s25 }
 0xbdf   :  { %2053 = vrot.lane.b32.xlu0 %v5114_v39, %s4689_s26 }
 0xbe0   :  { %2049 = vrot.lane.b32.xlu1 %v5114_v39, %s4686_s3 }
 0xbe3   :  { %2057 = vrot.lane.b32.xlu0 %v5114_v39, %s4690_s27 }
 0xbe4   :  { %2051 = vrot.lane.b32.xlu1 %v5112_v37, %s4686_s3 }
 0xbe8   :  { %2055 = vrot.lane.b32.xlu1 %v5112_v37, %s4689_s26 }
 0xbec   :  { %2133 = vrot.lane.b32.xlu1 %v5112_v37, %s4690_s27 }
 0xc4d   :  { %v5132_v40 = vpop.permute.xlu0 %2047 }
 0xc4e   :  { %2285 = vrot.lane.b32.xlu1 %v5132_v40, %s4690_s27  ;;  %v5136_v41 = vpop.permute.xlu1 %2045 }
 0xc4f   :  { %2209 = vrot.lane.b32.xlu0 %v5136_v41, %s4690_s27 }
 0xc51   :  { %v5140_v42 = vpop.permute.xlu0 %2053 }
 0xc52   :  { %v5142_v43 = vpop.permute.xlu1 %2049 }
 0xc53   :  { %2361 = vrot.lane.b32.xlu0 %v5142_v43, %s4690_s27 }
 0xc55   :  { %v2058_v44 = vpop.permute.xlu0 %2057 }
 0xc56   :  { %4337 = vmatpush3.xpose.msk.msra.mxu0 %vm254_vm4, %v2058_v44  ;;  %v5147_v45 = vpop.permute.xlu1 %2051 }
 0xc57   :  { %2513 = vrot.lane.b32.xlu0 %v5140_v42, %s4690_s27  ;;  %2437 = vrot.lane.b32.xlu1 %v5147_v45, %s4690_s27 }
 0xc58   :  { %4341 = vmatprep.subr.mxu0 %v4685_v19 }
 0xc59   :  { %4339 = vmatmul.mubr.msk.f32.vlgmr.msra.gmra.mrb[22].mxu0 %vm254_vm4, %v5114_v39 }
 0xc5a   :  { %v5156_v46 = vpop.permute.xlu1 %2055  ;;  %4343 = vmatprep.mubr.msk.f32.mxu0 %vm4688_vm3, %v4685_v19 }
 0xc5b   :  { %2589 = vrot.lane.b32.xlu1 %v5156_v46, %s4690_s27 }
 0xc5e   :  { %v2134_v47 = vpop.permute.xlu1 %2133 }
 0xc5f   :  { %4342 = vmatpush3.xpose.msk.msra.mxu0 %vm254_vm4, %v2134_v47 }
 0xc60   :  { %4351 = vmatprep.subr.mxu0 %v4685_v19 }
 0xc62   :  { %4344 = vmatmul.mubr.msk.f32.vlgmr.msra.gmra.mrb[24].mxu0 %vm254_vm4, %v5112_v37 }
 0xc63   :  { %4353 = vmatprep.mubr.msk.f32.mxu0 %vm4688_vm3, %v4685_v19 }
 0xcc0   :  { %v2286_v51 = vpop.permute.xlu1 %2285 }
 0xcc1   :  { %v2210_v52 = vpop.permute.xlu0 %2209  ;;  %4352 = vmatpush3.xpose.msk.msra.mxu0 %vm254_vm4, %v2286_v51 }
 0xcc2   :  { %4347 = vmatpush3.xpose.msk.msra.mxu1 %vm254_vm4, %v2210_v52  ;;  %4361 = vmatprep.subr.mxu0 %v4685_v19 }
 0xcc3   :  { %4356 = vmatprep.subr.mxu1 %v4685_v19 }
 0xcc4   :  { %4354 = vmatmul.mubr.msk.f32.vlgmr.msra.gmra.mrb[26].mxu0 %vm254_vm4, %v5132_v40 }
 0xcc5   :  { %4349 = vmatmul.mubr.msk.f32.vlgmr.msra.gmra.mrb[22].mxu1 %vm254_vm4, %v5136_v41  ;;  %v2362_v28 = vpop.permute.xlu0 %2361  ;;  %4363 = vmatprep.mubr.msk.f32.mxu0 %vm4688_vm3, %v4685_v19 }
 0xcc6   :  { %4357 = vmatpush3.xpose.msk.msra.mxu1 %vm254_vm4, %v2362_v28  ;;  %4358 = vmatprep.mubr.msk.f32.mxu1 %vm4688_vm3, %v4685_v19 }
 0xcc7   :  { %4366 = vmatprep.subr.mxu1 %v4685_v19 }
 0xcc9   :  { %4359 = vmatmul.mubr.msk.f32.vlgmr.msra.gmra.mrb[24].mxu1 %vm254_vm4, %v5142_v43  ;;  %v2514_v53 = vpop.permute.xlu0 %2513  ;;  %v2438_v54 = vpop.permute.xlu1 %2437 }
 0xcca   :  { %4362 = vmatpush3.xpose.msk.msra.mxu0 %vm254_vm4, %v2438_v54  ;;  %4367 = vmatpush3.xpose.msk.msra.mxu1 %vm254_vm4, %v2514_v53 }
 0xccb   :  { %4368 = vmatprep.mubr.msk.f32.mxu1 %vm4688_vm3, %v4685_v19  ;;  %4371 = vmatprep.subr.mxu0 %v4685_v19 }
 0xccc   :  { %4376 = vmatprep.subr.mxu1 %v4685_v19 }
 0xccd   :  { %4364 = vmatmul.mubr.msk.f32.vlgmr.msra.gmra.mrb[28].mxu0 %vm254_vm4, %v5147_v45  ;;  %4369 = vmatmul.mubr.msk.f32.vlgmr.msra.gmra.mrb[26].mxu1 %vm254_vm4, %v5140_v42  ;;  %v2590_v55 = vpop.permute.xlu1 %2589 }
 0xcce   :  { %4372 = vmatpush3.xpose.msk.msra.mxu0 %vm254_vm4, %v2590_v55  ;;  %4373 = vmatprep.mubr.msk.f32.mxu0 %vm4688_vm3, %v4685_v19 }
 0xccf   :  { %4381 = vmatprep.subr.mxu0 %v4685_v19  ;;  %4378 = vmatprep.mubr.msk.f32.mxu1 %vm4688_vm3, %v4685_v19 }
 0xcd1   :  { %4374 = vmatmul.mubr.msk.f32.vlgmr.msra.gmra.mrb[30].mxu0 %vm254_vm4, %v5156_v46 }
 0xcd2   :  { %4383 = vmatprep.mubr.msk.f32.mxu0 %vm4688_vm3, %v4685_v19 }
 0xd2c   :  { %v2129_v56 = vpop.f32.mrb[22].mxu0 }
 0xd2d   :  { %v4340_v57 = vpop.f32.mrb[23].mxu0  ;;  %v2665_v58 = vsel %vm254_vm4, %v2129_v56, -inf }
 0xd2e   :  { %2666 = vmax.xlane.f32.xlu0 %v2665_v58 }
 0xd35   :  { %v2205_v59 = vpop.f32.mrb[24].mxu0 }
 0xd36   :  { %v4345_v60 = vpop.f32.mrb[25].mxu0  ;;  %v2668_v61 = vsel %vm254_vm4, %v2205_v59, -inf }
 0xd37   :  { %2669 = vmax.xlane.f32.xlu1 %v2668_v61 }
 0xd97   :  { %v2357_v62 = vpop.f32.mrb[26].mxu0 }
 0xd98   :  { %v2281_v63 = vpop.f32.mrb[22].mxu1  ;;  %v4355_v0 = vpop.f32.mrb[27].mxu0  ;;  %v2674_v4 = vsel %vm254_vm4, %v2357_v62, -inf }
 0xd99   :  { %v4350_v1 = vpop.f32.mrb[23].mxu1  ;;  %v2671_v2 = vsel %vm254_vm4, %v2281_v63, -inf }
 0xd9a   :  { %2672 = vmax.xlane.f32.xlu0 %v2671_v2 }
 0xd9c   :  { %v2433_v16 = vpop.f32.mrb[24].mxu1 }
 0xd9d   :  { %v4360_v15 = vpop.f32.mrb[25].mxu1  ;;  %v2677_v3 = vsel %vm254_vm4, %v2433_v16, -inf }
 0xd9e   :  { %2678 = vmax.xlane.f32.xlu1 %v2677_v3  ;;  %2675 = vmax.xlane.f32.xlu0 %v2674_v4 }
 0xda0   :  { %v2509_v5 = vpop.f32.mrb[28].mxu0  ;;  %v2585_v6 = vpop.f32.mrb[26].mxu1 }
 0xda1   :  { %v4365_v7 = vpop.f32.mrb[29].mxu0  ;;  %v4370_v8 = vpop.f32.mrb[27].mxu1  ;;  %v2683_v9 = vsel %vm254_vm4, %v2585_v6, -inf  ;;  %v2680_v10 = vsel %vm254_vm4, %v2509_v5, -inf }
 0xda2   :  { %2684 = vmax.xlane.f32.xlu1 %v2683_v9  ;;  %2681 = vmax.xlane.f32.xlu0 %v2680_v10 }
 0xda4   :  { %v2661_v11 = vpop.f32.mrb[30].mxu0 }
 0xda5   :  { %v4375_v12 = vpop.f32.mrb[31].mxu0  ;;  %v2686_v13 = vsel %vm254_vm4, %v2661_v11, -inf }
 0xda6   :  { %2687 = vmax.xlane.f32.xlu0 %v2686_v13 }
 0xdb3   :  { %2753 = vrot.lane.b32.xlu1 %v5114_v39, %s4691_s28 }
 0xdb7   :  { %2905 = vrot.lane.b32.xlu1 %v5136_v41, %s4691_s28 }
 0xdbb   :  { %2981 = vrot.lane.b32.xlu1 %v5132_v40, %s4691_s28  ;;  %v2667_v18 = vpop.xlane.xlu0 %2666 }
 0xdbc   :  { %2829 = vrot.lane.b32.xlu0 %v5112_v37, %s4691_s28  ;;  %v2689_v24 = vsub.f32 %v2129_v56, %v2667_v18 }
 0xdbe   :  { %v2697_v26 = vmul.f32 1.442695, %v2689_v24 }
 0xdbf   :  { %3133 = vrot.lane.b32.xlu1 %v5147_v45, %s4691_s28 }
 0xdc0   :  { %3057 = vrot.lane.b32.xlu0 %v5142_v43, %s4691_s28 }
 0xdc4   :  { %v2670_v14 = vpop.xlane.xlu1 %2669 }
 0xdc5   :  { %v2690_v17 = vsub.f32 %v2205_v59, %v2670_v14 }
 0xdc7   :  { %v2699_v25 = vmul.f32 1.442695, %v2690_v17 }
 0xdc9   :  { %4621 = vpow2.f32 %v2699_v25 }
 0xdca   :  { %4623 = vpow2.f32 %v2697_v26 }
 0xdd3   :  { %v5224_v29 = vpop.eup %4621 }
 0xdd4   :  { %v2716_v30 = vsel %vm254_vm4, %v5224_v29, 0.0  ;;  %v5228_v31 = vpop.eup %4623 }
 0xdd5   :  { %v2713_v32 = vsel %vm254_vm4, %v5228_v31, 0.0 }
 0xddf   :  { %2717 = vadd.xlane.f32.xlu0 %v2716_v30 }
 0xde3   :  { %2714 = vadd.xlane.f32.xlu1 %v2713_v32 }
 0xe27   :  { %v2673_v33 = vpop.xlane.xlu0 %2672 }
 0xe28   :  { %v2691_v36 = vsub.f32 %v2281_v63, %v2673_v33 }
 0xe2a   :  { %v2701_v50 = vmul.f32 1.442695, %v2691_v36 }
 0xe2b   :  { %v2676_v37 = vpop.xlane.xlu0 %2675  ;;  %v2679_v38 = vpop.xlane.xlu1 %2678 }
 0xe2c   :  { %4625 = vpow2.f32 %v2701_v50  ;;  %v2692_v39 = vsub.f32 %v2357_v62, %v2676_v37  ;;  %v2693_v40 = vsub.f32 %v2433_v16, %v2679_v38 }
 0xe2e   :  { %v2703_v41 = vmul.f32 1.442695, %v2692_v39  ;;  %v2705_v43 = vmul.f32 1.442695, %v2693_v40 }
 0xe2f   :  { %v2682_v44 = vpop.xlane.xlu0 %2681  ;;  %v2685_v45 = vpop.xlane.xlu1 %2684 }
 0xe30   :  { %4627 = vpow2.f32 %v2703_v41  ;;  %v2694_v47 = vsub.f32 %v2509_v5, %v2682_v44  ;;  %v2695_v51 = vsub.f32 %v2585_v6, %v2685_v45 }
 0xe31   :  { %4629 = vpow2.f32 %v2705_v43 }
 0xe32   :  { %v2707_v52 = vmul.f32 1.442695, %v2694_v47  ;;  %v2709_v28 = vmul.f32 1.442695, %v2695_v51  ;;  %v4003_v51 = vld [vmem:[%s5520_s6 + $0x20] sm:$0xff] }
 0xe33   :  { %v2688_v53 = vpop.xlane.xlu0 %2687  ;;  %v2754_v54 = vpop.permute.xlu1 %2753 }
 0xe34   :  { %4631 = vpow2.f32 %v2707_v52  ;;  %v2696_v55 = vsub.f32 %v2661_v11, %v2688_v53  ;;  %4377 = vmatpush3.msra.mxu1 %v2754_v54  ;;  %v4004_v52 = vld [vmem:[%s5520_s6 + $0x28] sm:$0xff]  ;;  %v4006_v53 = vld [vmem:[%s5520_s6 + $0x38] sm:$0xff] }
 0xe35   :  { %4633 = vpow2.f32 %v2709_v28  ;;  %4386 = vmatprep.subr.mxu1 %v4685_v19  ;;  %v4505_v28 = vpack.c.bf16 %v4004_v52, %v4003_v51  ;;  %v4019_v51 = vld [vmem:[%s5523_s9 + $0x50] sm:$0xff] }
 0xe36   :  { %v4626_v56 = vpop.eup %4625  ;;  %v2711_v57 = vmul.f32 1.442695, %v2696_v55 }
 0xe37   :  { %v2830_v58 = vpop.permute.xlu0 %2829  ;;  %v2719_v59 = vsel %vm254_vm4, %v4626_v56, 0.0  ;;  %v2906_v4 = vpop.permute.xlu1 %2905 }
 0xe38   :  { %4635 = vpow2.f32 %v2711_v57  ;;  %2720 = vadd.xlane.f32.xlu1 %v2719_v59  ;;  %4382 = vmatpush3.msra.mxu0 %v2830_v58 }
 0xe39   :  { %4391 = vmatprep.subr.mxu0 %v4685_v19 }
 0xe3a   :  { %v4628_v60 = vpop.eup %4627 }
 0xe3b   :  { %v4630_v61 = vpop.eup %4629  ;;  %v2722_v62 = vsel %vm254_vm4, %v4628_v60, 0.0  ;;  %v2982_v5 = vpop.permute.xlu1 %2981 }
 0xe3c   :  { %2723 = vadd.xlane.f32.xlu0 %v2722_v62  ;;  %v2725_v63 = vsel %vm254_vm4, %v4630_v61, 0.0  ;;  %v3058_v6 = vpop.permute.xlu0 %3057 }
 0xe3d   :  { %2726 = vadd.xlane.f32.xlu1 %v2725_v63 }
 0xe3e   :  { %v4632_v0 = vpop.eup %4631 }
 0xe3f   :  { %v4634_v1 = vpop.eup %4633  ;;  %v2728_v2 = vsel %vm254_vm4, %v4632_v0, 0.0  ;;  %v3134_v7 = vpop.permute.xlu1 %3133 }
 0xe40   :  { %2729 = vadd.xlane.f32.xlu0 %v2728_v2  ;;  %v2731_v16 = vsel %vm254_vm4, %v4634_v1, 0.0 }
 0xe41   :  { %2732 = vadd.xlane.f32.xlu1 %v2731_v16 }
 0xe42   :  { %v5239_v15 = vpop.eup %4635 }
 0xe43   :  { %v2734_v3 = vsel %vm254_vm4, %v5239_v15, 0.0 }
 0xe44   :  { %2735 = vadd.xlane.f32.xlu0 %v2734_v3 }
 0xe52   :  { %3285 = vrot.lane.b32.xlu1 %v5156_v46, %s4691_s28 }
 0xe5a   :  { %3209 = vrot.lane.b32.xlu0 %v5140_v42, %s4691_s28 }
 0xe6c   :  { %v2718_v8 = vpop.xlane.xlu0 %2717 }
 0xe6d   :  { %4637 = vrcp.f32 %v2718_v8 }
 0xe70   :  { %v2715_v9 = vpop.xlane.xlu1 %2714 }
 0xe71   :  { %4639 = vrcp.f32 %v2715_v9 }
 0xe77   :  { %v4638_v10 = vpop.eup %4637 }
 0xe78   :  { %v2740_v11 = vmul.f32 %v4638_v10, %v5224_v29 }
 0xe7a   :  { %4384 = vmatmul.mubr.msk.f32.vlgmr.msra.gmra.mrb[32].mxu0 %vm254_vm4, %v2740_v11 }
 0xe7b   :  { %v4640_v12 = vpop.eup %4639  ;;  %4392 = vmatpush3.msra.mxu0 %v2982_v5  ;;  %4393 = vmatprep.mubr.msk.f32.mxu0 %vm4688_vm3, %v4685_v19 }
 0xe7c   :  { %v2738_v42 = vmul.f32 %v4640_v12, %v5228_v31  ;;  %4401 = vmatprep.subr.mxu0 %v4685_v19 }
 0xe7e   :  { %4379 = vmatmul.mubr.msk.f32.vlgmr.msra.gmra.mrb[28].mxu1 %vm254_vm4, %v2738_v42  ;;  %v5303_v42 = vld [vmem:[%s5524_s10 + $0x8] sm:$0x3f] }
 0xe7f   :  { %4387 = vmatpush3.msra.mxu1 %v2906_v4  ;;  %4388 = vmatprep.mubr.msk.f32.mxu1 %vm4688_vm3, %v4685_v19 }
 0xe80   :  { %4396 = vmatprep.subr.mxu1 %v4685_v19 }
 0xec5   :  { %v2721_v46 = vpop.xlane.xlu1 %2720 }
 0xec6   :  { %4641 = vrcp.f32 %v2721_v46  ;;  %v3399_v46 = vrot.slane %v5303_v42, %v1595_v49 }
 0xec9   :  { %v2724_v13 = vpop.xlane.xlu0 %2723 }
 0xeca   :  { %4643 = vrcp.f32 %v2724_v13  ;;  %v2727_v14 = vpop.xlane.xlu1 %2726 }
 0xecb   :  { %4645 = vrcp.f32 %v2727_v14 }
 0xecd   :  { %v2730_v17 = vpop.xlane.xlu0 %2729 }
 0xece   :  { %4647 = vrcp.f32 %v2730_v17  ;;  %v2733_v18 = vpop.xlane.xlu1 %2732 }
 0xecf   :  { %4649 = vrcp.f32 %v2733_v18 }
 0xed0   :  { %v4642_v24 = vpop.eup %4641 }
 0xed1   :  { %v2742_v25 = vmul.f32 %v4642_v24, %v4626_v56  ;;  %v2736_v26 = vpop.xlane.xlu0 %2735 }
 0xed2   :  { %4651 = vrcp.f32 %v2736_v26  ;;  %v3286_v39 = vpop.permute.xlu1 %3285 }
 0xed3   :  { %4389 = vmatmul.mubr.msk.f32.vlgmr.msra.gmra.mrb[30].mxu1 %vm254_vm4, %v2742_v25 }
 0xed4   :  { %v4644_v29 = vpop.eup %4643  ;;  %4397 = vmatpush3.msra.mxu1 %v3058_v6  ;;  %4398 = vmatprep.mubr.msk.f32.mxu1 %vm4688_vm3, %v4685_v19 }
 0xed5   :  { %v4646_v30 = vpop.eup %4645  ;;  %v2744_v31 = vmul.f32 %v4644_v29, %v4628_v60  ;;  %4406 = vmatprep.subr.mxu1 %v4685_v19  ;;  %v3210_v33 = vpop.permute.xlu0 %3209 }
 0xed6   :  { %v2746_v32 = vmul.f32 %v4646_v30, %v4630_v61 }
 0xed7   :  { %4394 = vmatmul.mubr.msk.f32.vlgmr.msra.gmra.mrb[34].mxu0 %vm254_vm4, %v2744_v31 }
 0xed8   :  { %v4648_v36 = vpop.eup %4647  ;;  %4399 = vmatmul.mubr.msk.f32.vlgmr.msra.gmra.mrb[32].mxu1 %vm254_vm4, %v2746_v32  ;;  %4402 = vmatpush3.msra.mxu0 %v3134_v7 }
 0xed9   :  { %v4650_v50 = vpop.eup %4649  ;;  %v2748_v37 = vmul.f32 %v4648_v36, %v4632_v0  ;;  %4407 = vmatpush3.msra.mxu1 %v3210_v33  ;;  %4403 = vmatprep.mubr.msk.f32.mxu0 %vm4688_vm3, %v4685_v19 }
 0xeda   :  { %v2750_v38 = vmul.f32 %v4650_v50, %v4634_v1  ;;  %4408 = vmatprep.mubr.msk.f32.mxu1 %vm4688_vm3, %v4685_v19  ;;  %4411 = vmatprep.subr.mxu0 %v4685_v19 }
 0xedb   :  { %4404 = vmatmul.mubr.msk.f32.vlgmr.msra.gmra.mrb[36].mxu0 %vm254_vm4, %v2748_v37  ;;  %4506 = vmatprep.subr.bf16.mxu1 %v4505_v28 }
 0xedc   :  { %v4652_v40 = vpop.eup %4651  ;;  %4409 = vmatmul.mubr.msk.f32.vlgmr.msra.gmra.mrb[34].mxu1 %vm254_vm4, %v2750_v38  ;;  %4412 = vmatpush3.msra.mxu0 %v3286_v39  ;;  %v4010_v39 = vld [vmem:[%s5521_s7 + $0x28] sm:$0xff] }
 0xedd   :  { %v2752_v41 = vmul.f32 %v4652_v40, %v5239_v15  ;;  %4413 = vmatprep.mubr.msk.f32.mxu0 %vm4688_vm3, %v4685_v19  ;;  %4508 = vmatpush3.bf16.msra.mxu1 %v4505_v28  ;;  %v4005_v19 = vld [vmem:[%s5520_s6 + $0x30] sm:$0xff]  ;;  %v4020_v28 = vld [vmem:[%s5523_s9 + $0x58] sm:$0xff] }
 0xede   :  { %v4509_v54 = vpack.c.bf16 %v4006_v53, %v4005_v19  ;;  %v4525_v19 = vpack.c.bf16 %v4020_v28, %v4019_v51  ;;  %v4021_v53 = vld [vmem:[%s5523_s9 + $0x60] sm:$0xff]  ;;  %v3811_v28 = vld [vmem:[%s5525_s11 + $0x18] sm:$0xff] }
 0xedf   :  { %4414 = vmatmul.mubr.msk.f32.vlgmr.msra.gmra.mrb[38].mxu0 %vm254_vm4, %v2752_v41  ;;  %v4011_v41 = vld [vmem:[%s5521_s7 + $0x30] sm:$0xff] }
 0xee0   :  { %4510 = vmatprep.subr.bf16.mxu1 %v4509_v54 }
 0xee1   :  { %4512 = vmatpush3.bf16.msra.mxu1 %v4509_v54  ;;  %v4022_v54 = vld [vmem:[%s5523_s9 + $0x68] sm:$0xff] }
 0xf4d   :  { %v2901_v43 = vpop.f32.mrb[32].mxu0 }
 0xf4e   :  { %v4385_v44 = vpop.f32.mrb[33].mxu0 }
 0xf51   :  { %v2825_v45 = vpop.f32.mrb[28].mxu1 }
 0xf52   :  { %v4380_v47 = vpop.f32.mrb[29].mxu1 }
 0xf53   :  { %v4018_v47 = vld [vmem:[%s5523_s9 + $0x48] sm:$0xff] }
 0xfa6   :  { %v2977_v55 = vpop.f32.mrb[30].mxu1 }
 0xfa7   :  { %3363 = vrot.lane.b32.xlu0 %v2977_v55, %s4692_s0  ;;  %v4390_v56 = vpop.f32.mrb[31].mxu1  ;;  %v4529_v55 = vpack.c.bf16 %v4022_v54, %v4021_v53  ;;  %v3829_v53 = vld [vmem:[%s5525_s11 + $0xa8] sm:$0xff] }
 0xfaa   :  { %v3053_v57 = vpop.f32.mrb[34].mxu0 }
 0xfab   :  { %v3129_v58 = vpop.f32.mrb[32].mxu1  ;;  %3365 = vrot.lane.b32.xlu1 %v3053_v57, %s4692_s0  ;;  %v4395_v59 = vpop.f32.mrb[35].mxu0 }
 0xfac   :  { %3371 = vrot.lane.b32.xlu0 %v3129_v58, %s4693_s19  ;;  %v4400_v60 = vpop.f32.mrb[33].mxu1 }
 0xfae   :  { %v3205_v61 = vpop.f32.mrb[36].mxu0 }
 0xfaf   :  { %v3281_v62 = vpop.f32.mrb[34].mxu1  ;;  %3373 = vrot.lane.b32.xlu1 %v3205_v61, %s4693_s19  ;;  %v4405_v63 = vpop.f32.mrb[37].mxu0 }
 0xfb0   :  { %3379 = vrot.lane.b32.xlu0 %v3281_v62, %s4694_s20  ;;  %v4410_v0 = vpop.f32.mrb[35].mxu1  ;;  %v3512_v62 = vrot.slane %v5303_v42, %v1709_v20  ;;  %v4023_v20 = vld [vmem:[%s5523_s9 + $0x70] sm:$0xff] }
 0xfb2   :  { %v3357_v1 = vpop.f32.mrb[38].mxu0 }
 0xfb3   :  { %3381 = vrot.lane.b32.xlu1 %v3357_v1, %s4694_s20  ;;  %v4415_v2 = vpop.f32.mrb[39].mxu0  ;;  %v3518_v1 = vrot.slane %v5303_v42, %v1715_v21  ;;  %v4014_v21 = vld [vmem:[%s5522_s8 + $0x1] ss:$0 sm:$0xff] }
0x1019   :  { %v3364_v16 = vpop.permute.xlu0 %3363 }
0x101a   :  { %v3385_v4 = vsel %vm254_vm4, %v2825_v45, %v3364_v16  ;;  %v4017_v45 = vld [vmem:[%s5523_s9 + $0x40] sm:$0xff] }
0x101b   :  { %v4521_v52 = vpack.c.bf16 %v4018_v47, %v4017_v45  ;;  %v3827_v45 = vld [vmem:[%s5525_s11 + $0x98] sm:$0xff] }
0x101d   :  { %v3366_v15 = vpop.permute.xlu1 %3365  ;;  %4522 = vmatprep.subr.bf16.mxu1 %v4521_v52 }
0x101e   :  { %v3372_v3 = vpop.permute.xlu0 %3371  ;;  %v3386_v9 = vsel %vm254_vm4, %v2901_v43, %v3366_v15  ;;  %v4012_v43 = vld [vmem:[%s5521_s7 + $0x38] sm:$0xff] }
0x101f   :  { %v3387_v6 = vsel %vm1583_vm5, %v3385_v4, %v3372_v3  ;;  %v4517_v44 = vpack.c.bf16 %v4012_v43, %v4011_v41  ;;  %v3809_v43 = vld [vmem:[%s5525_s11 + $0x8] sm:$0xff] }
0x1021   :  { %v3374_v5 = vpop.permute.xlu1 %3373 }
0x1022   :  { %v3380_v7 = vpop.permute.xlu0 %3379  ;;  %v3388_v10 = vsel %vm1583_vm5, %v3386_v9, %v3374_v5 }
0x1023   :  { %v3389_v8 = vsel %vm1586_vm6, %v3387_v6, %v3380_v7  ;;  %v4024_v6 = vld [vmem:[%s5523_s9 + $0x78] sm:$0xff] }
0x1024   :  { %4424 = vmatprep.mubr.msk.f32.mxu1 %vm156_vm2, %v3389_v8  ;;  %v4533_v7 = vpack.c.bf16 %v4024_v6, %v4023_v20 }
0x1025   :  { %v3382_v11 = vpop.permute.xlu1 %3381 }
0x1026   :  { %v3390_v12 = vsel %vm1586_vm6, %v3388_v10, %v3382_v11 }
0x1027   :  { %4425 = vmatmul.mubr.msk.f32.vlgmr.msra.gmra.mrb[36].mxu1 %vm156_vm2, %v3390_v12 }
0x1028   :  { %4524 = vmatpush3.bf16.msra.mxu1 %v4521_v52  ;;  %v3810_v52 = vld [vmem:[%s5525_s11 + $0x10] sm:$0xff] }
0x1029   :  { %4526 = vmatprep.subr.bf16.mxu1 %v4525_v19  ;;  %v4543_v54 = vpack.c.bf16 %v3811_v28, %v3810_v52 }
0x102c   :  { %4528 = vmatpush3.bf16.msra.mxu1 %v4525_v19  ;;  %v3828_v19 = vld [vmem:[%s5525_s11 + $0xa0] sm:$0xff] }
0x102d   :  { %4530 = vmatprep.subr.bf16.mxu1 %v4529_v55 }
0x1030   :  { %4532 = vmatpush3.bf16.msra.mxu1 %v4529_v55  ;;  %v4545_v55 = vpack.c.bf16 %v3829_v53, %v3828_v19 }
0x1031   :  { %4534 = vmatprep.subr.bf16.mxu1 %v4533_v7 }
0x1034   :  { %4536 = vmatpush3.bf16.msra.mxu1 %v4533_v7 }
0x10fa   :  { %v4426_v13 = vpop.f32.mrb[36].mxu1 }
0x10fb   :  { %v3478_v14 = vadd.f32 %v4426_v13, %v3399_v46  ;;  %v3472_v17 = vpop.f32.mrb[37].mxu1  ;;  %v3629_v13 = vrot.slane %v5303_v42, %v1823_v27 }
0x10fc   :  { %v3473_v18 = vadd.f32 %v3472_v17, %v3399_v46 }
0x10fd   :  { %v3482_v24 = vadd.f32 %v3478_v14, %v5101_v35 }
0x10fe   :  { %v3481_v25 = vadd.f32 %v3473_v18, %v5099_v34  ;;  %v4009_v34 = vld [vmem:[%s5521_s7 + $0x20] sm:$0xff] }
0x10ff   :  { %v3486_v26 = vsel %vm156_vm2, %v3482_v24, 0.0  ;;  %v4513_v40 = vpack.c.bf16 %v4010_v39, %v4009_v34  ;;  %v3824_v34 = vld [vmem:[%s5525_s11 + $0x80] sm:$0xff]  ;;  %v3825_v39 = vld [vmem:[%s5525_s11 + $0x88] sm:$0xff] }
0x1100   :  { %3487 = vadd.xlane.f32.xlu1 %v3486_v26  ;;  %v3483_v29 = vsel %vm156_vm2, %v3481_v25, 0.0  ;;  %v4537_v41 = vpack.c.bf16 %v3825_v39, %v3824_v34 }
0x1101   :  { %3484 = vadd.xlane.f32.xlu0 %v3483_v29  ;;  %4514 = vmatprep.subr.bf16.mxu0 %v4513_v40 }
0x1102   :  { %4516 = vmatpush3.bf16.msra.mxu0 %v4513_v40  ;;  %v3808_v40 = vld [vmem:[%s5525_s11] sm:$0xff] }
0x1103   :  { %4518 = vmatprep.subr.bf16.mxu0 %v4517_v44  ;;  %v4539_v47 = vpack.c.bf16 %v3809_v43, %v3808_v40  ;;  %v3822_v43 = vld [vmem:[%s5525_s11 + $0x70] sm:$0xff] }
0x1106   :  { %4520 = vmatpush3.bf16.msra.mxu0 %v4517_v44  ;;  %v3826_v44 = vld [vmem:[%s5525_s11 + $0x90] sm:$0xff] }
0x1107   :  { %v4541_v51 = vpack.c.bf16 %v3827_v45, %v3826_v44  ;;  %4538 = vmatprep.subr.bf16.mxu0 %v4537_v41  ;;  %v3839_v41 = vld [vmem:[%s5525_s11 + $0xf8] sm:$0xff] }
0x1108   :  { %v3823_v44 = vld [vmem:[%s5525_s11 + $0x78] sm:$0xff] }
0x118d   :  { %v3488_v30 = vpop.xlane.xlu1 %3487 }
0x118e   :  { %v3490_v31 = vmul.f32 0.03125, %v3488_v30  ;;  %v3485_v32 = vpop.xlane.xlu0 %3484 }
0x118f   :  { %v3489_v33 = vmul.f32 0.03125, %v3485_v32 }
0x1190   :  { %v3492_v36 = vsub.f32 %v3482_v24, %v3490_v31 }
0x1191   :  { %v3491_v49 = vsub.f32 %v3481_v25, %v3489_v33 }
0x1192   :  { %v3494_v38 = vmul.f32 %v3492_v36, %v3492_v36 }
0x1193   :  { %v3493_v50 = vmul.f32 %v3491_v49, %v3491_v49 }
0x1194   :  { %v3498_v35 = vsel %vm156_vm2, %v3494_v38, 0.0 }
0x1195   :  { %v3495_v37 = vsel %vm156_vm2, %v3493_v50, 0.0 }
0x1196   :  { %3496 = vadd.xlane.f32.xlu0 %v3495_v37 }
0x119a   :  { %3499 = vadd.xlane.f32.xlu0 %v3498_v35 }
0x1223   :  { %v3497_v56 = vpop.xlane.xlu0 %3496 }
0x1224   :  { %v3501_v57 = vmul.f32 0.03125, %v3497_v56  ;;  %v3812_v56 = vld [vmem:[%s5525_s11 + $0x20] sm:$0xff] }
0x1226   :  { %v3503_v58 = vadd.f32 1e-05, %v3501_v57  ;;  %v3813_v57 = vld [vmem:[%s5525_s11 + $0x28] sm:$0xff] }
0x1227   :  { %v3500_v59 = vpop.xlane.xlu0 %3499 }
0x1228   :  { %4653 = vrsqrt.f32 %v3503_v58  ;;  %v3502_v60 = vmul.f32 0.03125, %v3500_v59  ;;  %v3830_v58 = vld [vmem:[%s5525_s11 + $0xb0] sm:$0xff]  ;;  %v3831_v59 = vld [vmem:[%s5525_s11 + $0xb8] sm:$0xff] }
0x122a   :  { %v3504_v61 = vadd.f32 1e-05, %v3502_v60  ;;  %v4547_v60 = vpack.c.bf16 %v3813_v57, %v3812_v56 }
0x122c   :  { %4655 = vrsqrt.f32 %v3504_v61  ;;  %v4549_v61 = vpack.c.bf16 %v3831_v59, %v3830_v58 }
0x1232   :  { %v4654_v63 = vpop.eup %4653 }
0x1233   :  { %v3507_v0 = vmul.f32 %v4654_v63, %v3491_v49  ;;  %v3815_v63 = vld [vmem:[%s5525_s11 + $0x38] sm:$0xff] }
0x1235   :  { %v3513_v2 = vmul.f32 %v3512_v62, %v3507_v0  ;;  %v3832_v0 = vld [vmem:[%s5525_s11 + $0xc0] sm:$0xff] }
0x1236   :  { %v4656_v16 = vpop.eup %4655 }
0x1237   :  { %v3508_v15 = vmul.f32 %v4656_v16, %v3492_v36  ;;  %v3519_v3 = vadd.f32 %v3518_v1, %v3513_v2 }
0x1239   :  { %v3514_v4 = vmul.f32 %v3512_v62, %v3508_v15  ;;  %4435 = vmatprep.mubr.msk.f32.mxu0 %vm156_vm2, %v3519_v3  ;;  %v3814_v62 = vld [vmem:[%s5525_s11 + $0x30] sm:$0xff]  ;;  %v3816_v15 = vld [vmem:[%s5525_s11 + $0x40] sm:$0xff] }
0x123a   :  { %v4551_v2 = vpack.c.bf16 %v3815_v63, %v3814_v62 }
0x123b   :  { %v3520_v5 = vadd.f32 %v3518_v1, %v3514_v4  ;;  %v3833_v1 = vld [vmem:[%s5525_s11 + $0xc8] sm:$0xff] }
0x123c   :  { %v4553_v16 = vpack.c.bf16 %v3833_v1, %v3832_v0 }
0x123d   :  { %4436 = vmatmul.mubr.msk.f32.vlgmr.msra.gmra.mrb[40].mxu0 %vm156_vm2, %v3520_v5 }
0x123e   :  { %4540 = vmatpush3.bf16.msra.mxu0 %v4539_v47 }
0x123f   :  { %4542 = vmatprep.subr.bf16.mxu0 %v4541_v51 }
0x1242   :  { %4544 = vmatpush3.bf16.msra.mxu0 %v4543_v54  ;;  %v4567_v54 = vpack.c.bf16 %v3823_v44, %v3822_v43 }
0x1243   :  { %4546 = vmatprep.subr.bf16.mxu0 %v4545_v55 }
0x1246   :  { %4548 = vmatpush3.bf16.msra.mxu0 %v4547_v60 }
0x1247   :  { %4550 = vmatprep.subr.bf16.mxu0 %v4549_v61 }
0x124a   :  { %4552 = vmatpush3.bf16.msra.mxu0 %v4551_v2 }
0x124b   :  { %4554 = vmatprep.subr.bf16.mxu0 %v4553_v16 }
0x1310   :  { %v4437_v8 = vpop.f32.mrb[40].mxu0 }
0x1311   :  { %v3612_v9 = vadd.f32 %v4437_v8, %v4014_v21  ;;  %v3606_v10 = vpop.f32.mrb[41].mxu0 }
0x1312   :  { %v3607_v11 = vadd.f32 %v4014_v21, %v3606_v10 }
0x1313   :  { %v3616_v46 = vmax.f32 %v3612_v9, 0.0  ;;  %v3742_v9 = vrot.slane %v5303_v42, %v1937_v22 }
0x1314   :  { %v3615_v12 = vmax.f32 %v3607_v11, 0.0  ;;  %v3834_v11 = vld [vmem:[%s5525_s11 + $0xd0] sm:$0xff] }
0x1316   :  { %4454 = vmatprep.mubr.msk.f32.mxu1 %vm1825_vm7, %v3615_v12  ;;  %v3835_v12 = vld [vmem:[%s5525_s11 + $0xd8] sm:$0xff] }
0x1317   :  { %4455 = vmatmul.mubr.msk.f32.vlgmr.msra.gmra.mrb[38].mxu1 %vm1825_vm7, %v3616_v46  ;;  %v3818_v46 = vld [vmem:[%s5525_s11 + $0x50] sm:$0xff] }
0x13ea   :  { %v4456_v14 = vpop.f32.mrb[38].mxu1 }
0x13eb   :  { %v3708_v17 = vadd.f32 %v4456_v14, %v3629_v13  ;;  %v3702_v18 = vpop.f32.mrb[39].mxu1  ;;  %v3748_v14 = vrot.slane %v5303_v42, %v1943_v23  ;;  %v3837_v23 = vld [vmem:[%s5525_s11 + $0xe8] sm:$0xff]  ;;  %v3820_v42 = vld [vmem:[%s5525_s11 + $0x60] sm:$0xff] }
0x13ec   :  { %v3703_v24 = vadd.f32 %v3702_v18, %v3629_v13  ;;  %v3819_v18 = vld [vmem:[%s5525_s11 + $0x58] sm:$0xff] }
0x13ed   :  { %v3712_v25 = vadd.f32 %v3708_v17, %v3520_v5  ;;  %v4557_v17 = vpack.c.bf16 %v3835_v12, %v3834_v11 }
0x13ee   :  { %v3711_v26 = vadd.f32 %v3703_v24, %v3519_v3  ;;  %v3817_v3 = vld [vmem:[%s5525_s11 + $0x48] sm:$0xff] }
0x13ef   :  { %v3716_v29 = vsel %vm156_vm2, %v3712_v25, 0.0  ;;  %v4555_v4 = vpack.c.bf16 %v3817_v3, %v3816_v15 }
0x13f0   :  { %3717 = vadd.xlane.f32.xlu0 %v3716_v29  ;;  %v3713_v30 = vsel %vm156_vm2, %v3711_v26, 0.0 }
0x13f1   :  { %3714 = vadd.xlane.f32.xlu1 %v3713_v30  ;;  %4556 = vmatpush3.bf16.msra.mxu0 %v4555_v4 }
0x13f2   :  { %4558 = vmatprep.subr.bf16.mxu0 %v4557_v17 }
0x147d   :  { %v3718_v31 = vpop.xlane.xlu0 %3717 }
0x147e   :  { %v3720_v32 = vmul.f32 0.03125, %v3718_v31  ;;  %v3715_v33 = vpop.xlane.xlu1 %3714 }
0x147f   :  { %v3719_v36 = vmul.f32 0.03125, %v3715_v33  ;;  %v3821_v33 = vld [vmem:[%s5525_s11 + $0x68] sm:$0xff] }
0x1480   :  { %v5368_v49 = vsub.f32 %v3712_v25, %v3720_v32  ;;  %v4559_v25 = vpack.c.bf16 %v3819_v18, %v3818_v46  ;;  %v4561_v32 = vpack.c.bf16 %v3837_v23, %v3836_v48 }
0x1481   :  { %v5370_v50 = vsub.f32 %v3711_v26, %v3719_v36 }
0x1482   :  { %v3724_v27 = vmul.f32 %v5368_v49, %v5368_v49  ;;  %4560 = vmatpush3.bf16.msra.mxu0 %v4559_v25 }
0x1483   :  { %v3723_v37 = vmul.f32 %v5370_v50, %v5370_v50  ;;  %4562 = vmatprep.subr.bf16.mxu0 %v4561_v32 }
0x1484   :  { %v3728_v38 = vsel %vm156_vm2, %v3724_v27, 0.0 }
0x1485   :  { %3729 = vadd.xlane.f32.xlu0 %v3728_v38  ;;  %v3725_v35 = vsel %vm156_vm2, %v3723_v37, 0.0 }
0x1486   :  { %3726 = vadd.xlane.f32.xlu1 %v3725_v35  ;;  %v3838_v35 = vld [vmem:[%s5525_s11 + $0xf0] sm:$0xff] }
0x1487   :  { %v4565_v53 = vpack.c.bf16 %v3839_v41, %v3838_v35 }
0x1512   :  { %v3730_v5 = vpop.xlane.xlu0 %3729 }
0x1513   :  { %v3732_v20 = vmul.f32 0.03125, %v3730_v5  ;;  %v3727_v6 = vpop.xlane.xlu1 %3726 }
0x1514   :  { %v3731_v7 = vmul.f32 0.03125, %v3727_v6 }
0x1515   :  { %v3734_v21 = vadd.f32 1e-05, %v3732_v20 }
0x1516   :  { %v3733_v8 = vadd.f32 1e-05, %v3731_v7 }
0x1517   :  { %4657 = vrsqrt.f32 %v3734_v21 }
0x1518   :  { %4659 = vrsqrt.f32 %v3733_v8 }
0x1521   :  { %v4658_v10 = vpop.eup %4657 }
0x1522   :  { %v4660_v13 = vpop.eup %4659  ;;  %v3738_v22 = vmul.f32 %v4658_v10, %v5368_v49  ;;  %v4563_v49 = vpack.c.bf16 %v3821_v33, %v3820_v42  ;;  %v4027_v10 = vld [vmem:[%s5526_s12] ss:$0 sm:$0xff] }
0x1523   :  { %v3737_v24 = vmul.f32 %v4660_v13, %v5370_v50 }
0x1524   :  { %v3744_v26 = vmul.f32 %v3742_v9, %v3738_v22  ;;  %4564 = vmatpush3.bf16.msra.mxu0 %v4563_v49 }
0x1525   :  { %v3743_v29 = vmul.f32 %v3742_v9, %v3737_v24  ;;  %4566 = vmatprep.subr.bf16.mxu0 %v4565_v53 }
0x1526   :  { %v3750_v30 = vadd.f32 %v3748_v14, %v3744_v26 }
0x1527   :  { %v3749_v31 = vadd.f32 %v3748_v14, %v3743_v29 }
0x1528   :  { %v3752_v36 = vmax.f32 %v3750_v30, 0.0  ;;  %4568 = vmatpush3.bf16.msra.mxu0 %v4567_v54 }
0x1529   :  { %v3751_v50 = vmax.f32 %v3749_v31, 0.0 }
0x152a   :  { %v3781_v27 = vrot.slane %v3752_v36, 4  ;;  %v3787_v34 = vrot.slane %v3752_v36, 5  ;;  %v3793_v39 = vrot.slane %v3752_v36, 6  ;;  %v3777_v40 = vrot.slane %v3752_v36, 3 }
0x152b   :  { %v3780_v37 = vrot.slane %v3751_v50, 5  ;;  %v3759_v38 = vrot.slane %v3751_v50, 1  ;;  %v3786_v51 = vrot.slane %v3751_v50, 6  ;;  %v3792_v52 = vrot.slane %v3751_v50, 7 }
0x152c   :  { %v3776_v28 = vrot.slane %v3751_v50, 4  ;;  %v3755_v19 = vrot.slane %v3752_v36, 7  ;;  %v3764_v59 = vrot.slane %v3751_v50, 2  ;;  %v3765_v60 = vrot.slane %v3752_v36, 1 }
0x152d   :  { %v3782_v45 = vsel %vm3756_vm8, %v3781_v27, %v3780_v37  ;;  %v3760_v47 = vsel %vm3756_vm8, %v3752_v36, %v3759_v38  ;;  %v3788_v57 = vsel %vm3756_vm8, %v3787_v34, %v3786_v51  ;;  %v3794_v58 = vsel %vm3756_vm8, %v3793_v39, %v3792_v52 }
0x152e   :  { %3783 = vrot.lane.b32.xlu1 %v3782_v45, %s4695_s17  ;;  %3761 = vrot.lane.b32.xlu0 %v3760_v47, %s4695_s17  ;;  %v3778_v55 = vsel %vm3756_vm8, %v3777_v40, %v3776_v28  ;;  %v3757_v56 = vsel %vm3756_vm8, %v3755_v19, %v3751_v50  ;;  %v3766_v61 = vsel %vm3756_vm8, %v3765_v60, %v3764_v59  ;;  %v3770_v62 = vrot.slane %v3751_v50, 3 }
0x152f   :  { %v3771_v63 = vrot.slane %v3752_v36, 2 }
0x1531   :  { %v3772_v0 = vsel %vm3756_vm8, %v3771_v63, %v3770_v62 }
0x1532   :  { %3789 = vrot.lane.b32.xlu1 %v3788_v57, %s4691_s28  ;;  %3795 = vrot.lane.b32.xlu0 %v3794_v58, %s4690_s27 }
0x1536   :  { %3767 = vrot.lane.b32.xlu1 %v3766_v61, %s4691_s28  ;;  %s4696_s28 = smov [#allocation2]  }
0x1537   :  { %s3924_s5 = sshll.u32 %s4696_s28, 4  ;;  %s3925_s5 = int_to_ptr.vmem [resolvable:$true] %s3924_s5 }
0x1538   :  { %s4661_s3 = scalar_lea.vmem %s3925_s5, 128  ;;  %p4666_p1 = scmp.lt.s32.totalorder %s3925_s5, %s3925_s5 }
0x1539   :  { %p4662_p0 = scmp.ne.s32.totalorder %s3925_s5, %s4661_s3  ;;  %p4667_p2 = scmp.lt.s32.totalorder %s4661_s3, %s4661_s3 }
0x153a   :  { %3773 = vrot.lane.b32.xlu1 %v3772_v0, %s4690_s27 }
0x153b   :  { %p4668_p3 = por %p4667_p2, %p4666_p1 }
0x153d   :  { %p4669_p4 = pnand %p4668_p3, %p4662_p0 }
0x15a0   :  { %v3784_v1 = vpop.permute.xlu1 %3783  ;;  %v3762_v2 = vpop.permute.xlu0 %3761 }
0x15a1   :  { %v3802_v16 = vsel %vm156_vm2, %v3778_v55, %v3784_v1  ;;  %v3798_v6 = vsel %vm156_vm2, %v3757_v56, %v3762_v2 }
0x15a4   :  { %v3790_v15 = vpop.permute.xlu1 %3789  ;;  %v3796_v3 = vpop.permute.xlu0 %3795 }
0x15a5   :  { %v3803_v4 = vsel %vm1825_vm7, %v3802_v16, %v3790_v15 }
0x15a6   :  { %v3804_v5 = vsel %vm3800_vm9, %v3803_v4, %v3796_v3 }
0x15a7   :  { %4028 = vmatprep.mubr.msk.f32.mxu0 %vm3805_vm10, %v3804_v5 }
0x15a8   :  { %v3768_v20 = vpop.permute.xlu1 %3767 }
0x15a9   :  { %v3799_v7 = vsel %vm1825_vm7, %v3798_v6, %v3768_v20 }
0x15ac   :  { %v3774_v21 = vpop.permute.xlu1 %3773 }
0x15ad   :  { %v3801_v8 = vsel %vm3800_vm9, %v3799_v7, %v3774_v21 }
0x15ae   :  { %4029 = vmatmul.mubr.msk.f32.vlgmr.msra.gmra.mrb[42].mxu0 %vm3805_vm10, %v3801_v8 }
0x1681   :  { %v4185_v9 = vpop.f32.mrb[42].mxu0 }
0x1682   :  { %v4186_v11 = vpop.f32.mrb[43].mxu0 }
0x1683   :  { %v4187_v12 = vadd.f32 %v4186_v11, %v4185_v9 }
0x1685   :  { %v3914_v46 = vadd.f32 %v4187_v12, %v4027_v10 }
0x1687   :  { %3917 = vst.msk [vmem:[#allocation2] sm:$0xff] %vm254_vm4, %v3914_v46 }
0x1688   :  { %4672 = shalt.err (!%p4669_p4)
}
0x1689   :  { %s4673_s26 = scalar_lea.hbm %s5527_s13, 128 }
0x168a   :  { %p4674_p5 = scmp.ne.s32.totalorder %s5527_s13, %s4673_s26  ;;  %p4677_p6 = scmp.lt.u32.totalorder %s4673_s26, %s5527_s13 }
0x168c   :  { %p4679_p7 = pnand %p4677_p6, %p4674_p5 }
0x168e   :  { %4682 = shalt.err (!%p4679_p7)
}
0x168f   :  { %3927 = dma.vmem_to_hbm [thread:$0]  %s3925_s5, 128, %s5527_s13, [#allocation3]  }
0x1690   :  { %4683 = dma.done.wait [#allocation3], 128  }
0x1691   :  { %4684 = vsyncadd [#allocation3], 4294967168 }
0x1692   :  { %3931 = vsyncpa [#allocation3], 1 }

</bundles_post_ra>
